<compile_context>
chip_gen: v7x
topology: tpu7x:2x2x1
jax: 0.10.0
libtpu: 0.0.40
codegen_flags: <defaults>
</compile_context>

<pallas_src>
import functools

import jax
import jax.numpy as jnp
from jax.experimental import pallas as pl
from jax.experimental.pallas import tpu as pltpu


def _round_up(n, m):
    return (n + m - 1) // m * m


def _lstm_fc_kernel(x_ref, w_ih_ref, w_hh_ref, b_ref, w_fc_ref, b_fc_ref,
                    out_ref, xp_ref, *, seq_len, batch_pad, hidden_pad):
    """Single-layer LSTM + Linear on last hidden.

    Gate column layout (kernel-internal): [i | f | o | g], each block Hp wide.

    x_ref    : (T*Bp, D)        time-major, batch padded to Bp (multiple of 8)
    w_ih_ref : (D, 4*Hp)        gate k in columns [k*Hp, k*Hp+H), zeros elsewhere
    w_hh_ref : (Hp, 4*Hp)       same column layout, rows >= H are zero
    b_ref    : (1, 4*Hp)        b_ih + b_hh, embedded in the same column layout
    w_fc_ref : (Hp, Op)         rows >= H / cols >= O are zero
    b_fc_ref : (1, Op)
    out_ref  : (Bp, Op)         lane-dense padded output tile
    xp_ref   : (T*Bp, 4*Hp)     VMEM scratch for the hoisted input projection
    """
    Bp, Hp = batch_pad, hidden_pad

    # ---- Hoisted input projection: one MXU call for every timestep ----------
    xp_ref[...] = (
        jnp.dot(x_ref[...], w_ih_ref[...], preferred_element_type=jnp.float32)
        + b_ref[...])                                          # (T*Bp, 4*Hp)

    h0 = jnp.zeros((Bp, Hp), jnp.float32)
    c0 = jnp.zeros((Bp, Hp), jnp.float32)

    def step(t, carry):
        h, c = carry
        # Sublane-aligned (Bp, 4*Hp) window of the precomputed projection.
        xp_t = xp_ref[pl.ds(pl.multiple_of(t * Bp, Bp), Bp), :]
        # Single recurrent matmul per step.
        gates = xp_t + jnp.dot(h, w_hh_ref[...],
                               preferred_element_type=jnp.float32)
        # Hp is a multiple of 128 -> every slice below is lane-aligned.
        # One contiguous sigmoid over [i|f|o], one tanh over [g].
        ifo = jax.nn.sigmoid(gates[:, 0:3 * Hp])
        g = jnp.tanh(gates[:, 3 * Hp:4 * Hp])
        i = ifo[:, 0 * Hp:1 * Hp]
        f = ifo[:, 1 * Hp:2 * Hp]
        o = ifo[:, 2 * Hp:3 * Hp]
        c_new = f * c + i * g
        h_new = o * jnp.tanh(c_new)
        return (h_new, c_new)

    # Short fixed trip count: fully unroll for cross-step VLIW scheduling.
    h_last, _ = jax.lax.fori_loop(0, seq_len, step, (h0, c0), unroll=True)

    # fc(out[:, -1, :]) into a lane-dense padded tile.
    out_ref[...] = (jnp.dot(h_last, w_fc_ref[...],
                            preferred_element_type=jnp.float32)
                    + b_fc_ref[...])


def lstm_classifier(x, params):
    """x: (B, T, D) float32, batch-first (same as the PyTorch module)."""
    w_ih, w_hh, b_ih, b_hh, w_fc, b_fc = (params[k] for k in
                                          ("w_ih", "w_hh", "b_ih", "b_hh",
                                           "w_fc", "b_fc"))
    B, T, D = x.shape
    H = w_hh.shape[1]
    O = w_fc.shape[0]

    Hp = _round_up(H, 128)   # lane-aligned gate blocks
    Bp = _round_up(B, 8)     # full sublane tile per step
    Op = _round_up(O, 128)   # lane-dense output store

    # Time-major, batch padded, flattened: each step is rows [t*Bp, (t+1)*Bp).
    x_pad = jnp.zeros((Bp, T, D), jnp.float32).at[:B].set(x.astype(jnp.float32))
    x_tb = jnp.transpose(x_pad, (1, 0, 2)).reshape(T * Bp, D)

    # PyTorch gate order is (i, f, g, o); kernel layout is (i, f, o, g) so the
    # sigmoid gates are contiguous.  src_gate[k] = source block for dest block k.
    src_gate = (0, 1, 3, 2)

    def pad_gate_cols(w_t):
        # (rows, 4H) -> (rows, 4Hp): dest block k <- source gate src_gate[k],
        # placed in columns [k*Hp, k*Hp+H), zeros elsewhere.
        rows = w_t.shape[0]
        out = jnp.zeros((rows, 4 * Hp), jnp.float32)
        for k in range(4):
            s = src_gate[k]
            out = out.at[:, k * Hp:k * Hp + H].set(w_t[:, s * H:(s + 1) * H])
        return out

    w_ih_p = pad_gate_cols(jnp.transpose(w_ih).astype(jnp.float32))       # (D, 4Hp)
    w_hh_p = jnp.zeros((Hp, 4 * Hp), jnp.float32).at[:H].set(
        pad_gate_cols(jnp.transpose(w_hh).astype(jnp.float32)))           # (Hp, 4Hp)
    b_p = pad_gate_cols((b_ih + b_hh).astype(jnp.float32).reshape(1, 4 * H))

    w_fc_p = jnp.zeros((Hp, Op), jnp.float32).at[:H, :O].set(
        jnp.transpose(w_fc).astype(jnp.float32))                          # (Hp, Op)
    b_fc_p = jnp.zeros((1, Op), jnp.float32).at[0, :O].set(
        b_fc.astype(jnp.float32))

    vmem = pl.BlockSpec(memory_space=pltpu.MemorySpace.VMEM)
    kernel = functools.partial(_lstm_fc_kernel, seq_len=T, batch_pad=Bp,
                               hidden_pad=Hp)

    out_pad = pl.pallas_call(
        kernel,
        out_shape=jax.ShapeDtypeStruct((Bp, Op), jnp.float32),
        in_specs=[vmem] * 6,
        out_specs=vmem,
        scratch_shapes=[pltpu.VMEM((T * Bp, 4 * Hp), jnp.float32)],
    )(x_tb, w_ih_p, w_hh_p, b_p, w_fc_p, b_fc_p)

    return out_pad[:B, :O]


def _reference(x, params):
    """Pure-JAX reference mirroring torch.nn.LSTM + Linear semantics."""
    w_ih, w_hh, b_ih, b_hh, w_fc, b_fc = (params[k] for k in
                                          ("w_ih", "w_hh", "b_ih", "b_hh",
                                           "w_fc", "b_fc"))
    B, T, D = x.shape
    H = w_hh.shape[1]
    h = jnp.zeros((B, H), jnp.float32)
    c = jnp.zeros((B, H), jnp.float32)
    for t in range(T):
        gates = x[:, t, :] @ w_ih.T + b_ih + h @ w_hh.T + b_hh
        i = jax.nn.sigmoid(gates[:, 0 * H:1 * H])
        f = jax.nn.sigmoid(gates[:, 1 * H:2 * H])
        g = jnp.tanh(gates[:, 2 * H:3 * H])
        o = jax.nn.sigmoid(gates[:, 3 * H:4 * H])
        c = f * c + i * g
        h = o * jnp.tanh(c)
    return h @ w_fc.T + b_fc


def init_params(key, input_size, hidden_size, output_size):
    """Same uniform(-1/sqrt(H), 1/sqrt(H)) scheme as PyTorch defaults."""
    ks = jax.random.split(key, 6)
    s = 1.0 / jnp.sqrt(hidden_size)
    u = lambda k, shape: jax.random.uniform(k, shape, jnp.float32, -s, s)
    return {
        "w_ih": u(ks[0], (4 * hidden_size, input_size)),
        "w_hh": u(ks[1], (4 * hidden_size, hidden_size)),
        "b_ih": u(ks[2], (4 * hidden_size,)),
        "b_hh": u(ks[3], (4 * hidden_size,)),
        "w_fc": u(ks[4], (output_size, hidden_size)),
        "b_fc": u(ks[5], (output_size,)),
    }


if __name__ == "__main__":
    INPUT_SIZE = 5        # module default input_size=5
    HIDDEN = 50           # module default hidden_layer_size=50 (padded to 128)
    OUTPUT = 2            # module default output_size=2
    BATCH, SEQ = 2, 8

    key = jax.random.PRNGKey(0)
    k_x, k_p = jax.random.split(key)
    x = jax.random.normal(k_x, (BATCH, SEQ, INPUT_SIZE), jnp.float32)
    params = init_params(k_p, INPUT_SIZE, HIDDEN, OUTPUT)

    out = jax.block_until_ready(lstm_classifier(x, params))
    ref = jax.block_until_ready(_reference(x, params))

    assert out.shape == (BATCH, OUTPUT), out.shape
    assert jnp.allclose(out, ref, atol=1e-4, rtol=1e-4), (out, ref)
    print("KERNEL_OK")
</pallas_src>

<mosaic_0001>
module attributes {stable_mosaic.version = 11 : i64} {
  func.func @_lstm_fc_kernel(%arg0: memref<64x5xf32, #tpu.memory_space<vmem>>, %arg1: memref<5x512xf32, #tpu.memory_space<vmem>>, %arg2: memref<128x512xf32, #tpu.memory_space<vmem>>, %arg3: memref<1x512xf32, #tpu.memory_space<vmem>>, %arg4: memref<128x128xf32, #tpu.memory_space<vmem>>, %arg5: memref<1x128xf32, #tpu.memory_space<vmem>>, %arg6: memref<8x128xf32, #tpu.memory_space<vmem>>, %arg7: memref<64x512xf32, #tpu.memory_space<vmem>>) attributes {dimension_semantics = [], scalar_prefetch = 0 : i64, scratch_operands = 1 : i64, tpu.core_type = #tpu.core_type<tc>} {
    %c0 = arith.constant 0 : index
    %c0_0 = arith.constant 0 : index
    %0 = vector.load %arg0[%c0, %c0_0] : memref<64x5xf32, #tpu.memory_space<vmem>>, vector<64x5xf32>
    %c0_1 = arith.constant 0 : index
    %c0_2 = arith.constant 0 : index
    %1 = vector.load %arg1[%c0_1, %c0_2] : memref<5x512xf32, #tpu.memory_space<vmem>>, vector<5x512xf32>
    %cst = arith.constant dense<0.000000e+00> : vector<64x512xf32>
    %2 = tpu.matmul %0, %1, %cst {dimension_numbers = #tpu.dot_dimension_numbers<[1], [0], [0], [1], [0, 0, 1, 1], [], []>} : vector<64x5xf32>, vector<5x512xf32>, vector<64x512xf32> -> vector<64x512xf32>
    %c0_3 = arith.constant 0 : index
    %c0_4 = arith.constant 0 : index
    %3 = vector.load %arg3[%c0_3, %c0_4] : memref<1x512xf32, #tpu.memory_space<vmem>>, vector<1x512xf32>
    %4 = vector.broadcast %3 : vector<1x512xf32> to vector<64x512xf32>
    %5 = arith.addf %2, %4 : vector<64x512xf32>
    %c0_5 = arith.constant 0 : index
    %c0_6 = arith.constant 0 : index
    %6 = vector.load %arg7[%c0_5, %c0_6] : memref<64x512xf32, #tpu.memory_space<vmem>>, vector<64x512xf32>
    tpu.vector_store %arg7[%c0_5, %c0_6], %5 {strides = array<i32>} : memref<64x512xf32, #tpu.memory_space<vmem>>, vector<64x512xf32>,
    %cst_7 = arith.constant 0.000000e+00 : f32
    %7 = vector.broadcast %cst_7 : f32 to vector<8x128xf32>
    %cst_8 = arith.constant 0.000000e+00 : f32
    %8 = vector.broadcast %cst_8 : f32 to vector<8x128xf32>
    %c0_i32 = arith.constant 0 : i32
    %c8_i32 = arith.constant 8 : i32
    %9 = arith.muli %c0_i32, %c8_i32 : i32
    %10 = tpu.assume_multiple %9, 8 : i32
    %11 = arith.index_cast %10 : i32 to index
    %c0_9 = arith.constant 0 : index
    %12 = vector.load %arg7[%11, %c0_9] : memref<64x512xf32, #tpu.memory_space<vmem>>, vector<8x512xf32>
    %c0_10 = arith.constant 0 : index
    %c0_11 = arith.constant 0 : index
    %13 = vector.load %arg2[%c0_10, %c0_11] : memref<128x512xf32, #tpu.memory_space<vmem>>, vector<128x512xf32>
    %cst_12 = arith.constant dense<0.000000e+00> : vector<8x512xf32>
    %14 = tpu.matmul %7, %13, %cst_12 {dimension_numbers = #tpu.dot_dimension_numbers<[1], [0], [0], [1], [0, 0, 1, 1], [], []>} : vector<8x128xf32>, vector<128x512xf32>, vector<8x512xf32> -> vector<8x512xf32>
    %15 = arith.addf %12, %14 : vector<8x512xf32>
    %16 = vector.extract_strided_slice %15 {offsets = [0, 0], sizes = [8, 384], strides = [1, 1]} : vector<8x512xf32> to vector<8x384xf32>
    %17 = arith.negf %16 : vector<8x384xf32>
    %18 = math.exp %17 : vector<8x384xf32>
    %cst_13 = arith.constant 1.000000e+00 : f32
    %19 = vector.broadcast %cst_13 : f32 to vector<8x384xf32>
    %20 = arith.addf %19, %18 : vector<8x384xf32>
    %21 = arith.divf %19, %20 : vector<8x384xf32>
    %22 = vector.extract_strided_slice %15 {offsets = [0, 384], sizes = [8, 128], strides = [1, 1]} : vector<8x512xf32> to vector<8x128xf32>
    %23 = math.tanh %22 : vector<8x128xf32>
    %24 = vector.extract_strided_slice %21 {offsets = [0, 0], sizes = [8, 128], strides = [1, 1]} : vector<8x384xf32> to vector<8x128xf32>
    %25 = vector.extract_strided_slice %21 {offsets = [0, 128], sizes = [8, 128], strides = [1, 1]} : vector<8x384xf32> to vector<8x128xf32>
    %26 = vector.extract_strided_slice %21 {offsets = [0, 256], sizes = [8, 128], strides = [1, 1]} : vector<8x384xf32> to vector<8x128xf32>
    %27 = arith.mulf %25, %8 : vector<8x128xf32>
    %28 = arith.mulf %24, %23 : vector<8x128xf32>
    %29 = arith.addf %27, %28 : vector<8x128xf32>
    %30 = math.tanh %29 : vector<8x128xf32>
    %31 = arith.mulf %26, %30 : vector<8x128xf32>
    %c1_i32 = arith.constant 1 : i32
    %c8_i32_14 = arith.constant 8 : i32
    %32 = arith.muli %c1_i32, %c8_i32_14 : i32
    %33 = tpu.assume_multiple %32, 8 : i32
    %34 = arith.index_cast %33 : i32 to index
    %c0_15 = arith.constant 0 : index
    %35 = vector.load %arg7[%34, %c0_15] : memref<64x512xf32, #tpu.memory_space<vmem>>, vector<8x512xf32>
    %c0_16 = arith.constant 0 : index
    %c0_17 = arith.constant 0 : index
    %36 = vector.load %arg2[%c0_16, %c0_17] : memref<128x512xf32, #tpu.memory_space<vmem>>, vector<128x512xf32>
    %cst_18 = arith.constant dense<0.000000e+00> : vector<8x512xf32>
    %37 = tpu.matmul %31, %36, %cst_18 {dimension_numbers = #tpu.dot_dimension_numbers<[1], [0], [0], [1], [0, 0, 1, 1], [], []>} : vector<8x128xf32>, vector<128x512xf32>, vector<8x512xf32> -> vector<8x512xf32>
    %38 = arith.addf %35, %37 : vector<8x512xf32>
    %39 = vector.extract_strided_slice %38 {offsets = [0, 0], sizes = [8, 384], strides = [1, 1]} : vector<8x512xf32> to vector<8x384xf32>
    %40 = arith.negf %39 : vector<8x384xf32>
    %41 = math.exp %40 : vector<8x384xf32>
    %cst_19 = arith.constant 1.000000e+00 : f32
    %42 = vector.broadcast %cst_19 : f32 to vector<8x384xf32>
    %43 = arith.addf %42, %41 : vector<8x384xf32>
    %44 = arith.divf %42, %43 : vector<8x384xf32>
    %45 = vector.extract_strided_slice %38 {offsets = [0, 384], sizes = [8, 128], strides = [1, 1]} : vector<8x512xf32> to vector<8x128xf32>
    %46 = math.tanh %45 : vector<8x128xf32>
    %47 = vector.extract_strided_slice %44 {offsets = [0, 0], sizes = [8, 128], strides = [1, 1]} : vector<8x384xf32> to vector<8x128xf32>
    %48 = vector.extract_strided_slice %44 {offsets = [0, 128], sizes = [8, 128], strides = [1, 1]} : vector<8x384xf32> to vector<8x128xf32>
    %49 = vector.extract_strided_slice %44 {offsets = [0, 256], sizes = [8, 128], strides = [1, 1]} : vector<8x384xf32> to vector<8x128xf32>
    %50 = arith.mulf %48, %29 : vector<8x128xf32>
    %51 = arith.mulf %47, %46 : vector<8x128xf32>
    %52 = arith.addf %50, %51 : vector<8x128xf32>
    %53 = math.tanh %52 : vector<8x128xf32>
    %54 = arith.mulf %49, %53 : vector<8x128xf32>
    %c2_i32 = arith.constant 2 : i32
    %c8_i32_20 = arith.constant 8 : i32
    %55 = arith.muli %c2_i32, %c8_i32_20 : i32
    %56 = tpu.assume_multiple %55, 8 : i32
    %57 = arith.index_cast %56 : i32 to index
    %c0_21 = arith.constant 0 : index
    %58 = vector.load %arg7[%57, %c0_21] : memref<64x512xf32, #tpu.memory_space<vmem>>, vector<8x512xf32>
    %c0_22 = arith.constant 0 : index
    %c0_23 = arith.constant 0 : index
    %59 = vector.load %arg2[%c0_22, %c0_23] : memref<128x512xf32, #tpu.memory_space<vmem>>, vector<128x512xf32>
    %cst_24 = arith.constant dense<0.000000e+00> : vector<8x512xf32>
    %60 = tpu.matmul %54, %59, %cst_24 {dimension_numbers = #tpu.dot_dimension_numbers<[1], [0], [0], [1], [0, 0, 1, 1], [], []>} : vector<8x128xf32>, vector<128x512xf32>, vector<8x512xf32> -> vector<8x512xf32>
    %61 = arith.addf %58, %60 : vector<8x512xf32>
    %62 = vector.extract_strided_slice %61 {offsets = [0, 0], sizes = [8, 384], strides = [1, 1]} : vector<8x512xf32> to vector<8x384xf32>
    %63 = arith.negf %62 : vector<8x384xf32>
    %64 = math.exp %63 : vector<8x384xf32>
    %cst_25 = arith.constant 1.000000e+00 : f32
    %65 = vector.broadcast %cst_25 : f32 to vector<8x384xf32>
    %66 = arith.addf %65, %64 : vector<8x384xf32>
    %67 = arith.divf %65, %66 : vector<8x384xf32>
    %68 = vector.extract_strided_slice %61 {offsets = [0, 384], sizes = [8, 128], strides = [1, 1]} : vector<8x512xf32> to vector<8x128xf32>
    %69 = math.tanh %68 : vector<8x128xf32>
    %70 = vector.extract_strided_slice %67 {offsets = [0, 0], sizes = [8, 128], strides = [1, 1]} : vector<8x384xf32> to vector<8x128xf32>
    %71 = vector.extract_strided_slice %67 {offsets = [0, 128], sizes = [8, 128], strides = [1, 1]} : vector<8x384xf32> to vector<8x128xf32>
    %72 = vector.extract_strided_slice %67 {offsets = [0, 256], sizes = [8, 128], strides = [1, 1]} : vector<8x384xf32> to vector<8x128xf32>
    %73 = arith.mulf %71, %52 : vector<8x128xf32>
    %74 = arith.mulf %70, %69 : vector<8x128xf32>
    %75 = arith.addf %73, %74 : vector<8x128xf32>
    %76 = math.tanh %75 : vector<8x128xf32>
    %77 = arith.mulf %72, %76 : vector<8x128xf32>
    %c3_i32 = arith.constant 3 : i32
    %c8_i32_26 = arith.constant 8 : i32
    %78 = arith.muli %c3_i32, %c8_i32_26 : i32
    %79 = tpu.assume_multiple %78, 8 : i32
    %80 = arith.index_cast %79 : i32 to index
    %c0_27 = arith.constant 0 : index
    %81 = vector.load %arg7[%80, %c0_27] : memref<64x512xf32, #tpu.memory_space<vmem>>, vector<8x512xf32>
    %c0_28 = arith.constant 0 : index
    %c0_29 = arith.constant 0 : index
    %82 = vector.load %arg2[%c0_28, %c0_29] : memref<128x512xf32, #tpu.memory_space<vmem>>, vector<128x512xf32>
    %cst_30 = arith.constant dense<0.000000e+00> : vector<8x512xf32>
    %83 = tpu.matmul %77, %82, %cst_30 {dimension_numbers = #tpu.dot_dimension_numbers<[1], [0], [0], [1], [0, 0, 1, 1], [], []>} : vector<8x128xf32>, vector<128x512xf32>, vector<8x512xf32> -> vector<8x512xf32>
    %84 = arith.addf %81, %83 : vector<8x512xf32>
    %85 = vector.extract_strided_slice %84 {offsets = [0, 0], sizes = [8, 384], strides = [1, 1]} : vector<8x512xf32> to vector<8x384xf32>
    %86 = arith.negf %85 : vector<8x384xf32>
    %87 = math.exp %86 : vector<8x384xf32>
    %cst_31 = arith.constant 1.000000e+00 : f32
    %88 = vector.broadcast %cst_31 : f32 to vector<8x384xf32>
    %89 = arith.addf %88, %87 : vector<8x384xf32>
    %90 = arith.divf %88, %89 : vector<8x384xf32>
    %91 = vector.extract_strided_slice %84 {offsets = [0, 384], sizes = [8, 128], strides = [1, 1]} : vector<8x512xf32> to vector<8x128xf32>
    %92 = math.tanh %91 : vector<8x128xf32>
    %93 = vector.extract_strided_slice %90 {offsets = [0, 0], sizes = [8, 128], strides = [1, 1]} : vector<8x384xf32> to vector<8x128xf32>
    %94 = vector.extract_strided_slice %90 {offsets = [0, 128], sizes = [8, 128], strides = [1, 1]} : vector<8x384xf32> to vector<8x128xf32>
    %95 = vector.extract_strided_slice %90 {offsets = [0, 256], sizes = [8, 128], strides = [1, 1]} : vector<8x384xf32> to vector<8x128xf32>
    %96 = arith.mulf %94, %75 : vector<8x128xf32>
    %97 = arith.mulf %93, %92 : vector<8x128xf32>
    %98 = arith.addf %96, %97 : vector<8x128xf32>
    %99 = math.tanh %98 : vector<8x128xf32>
    %100 = arith.mulf %95, %99 : vector<8x128xf32>
    %c4_i32 = arith.constant 4 : i32
    %c8_i32_32 = arith.constant 8 : i32
    %101 = arith.muli %c4_i32, %c8_i32_32 : i32
    %102 = tpu.assume_multiple %101, 8 : i32
    %103 = arith.index_cast %102 : i32 to index
    %c0_33 = arith.constant 0 : index
    %104 = vector.load %arg7[%103, %c0_33] : memref<64x512xf32, #tpu.memory_space<vmem>>, vector<8x512xf32>
    %c0_34 = arith.constant 0 : index
    %c0_35 = arith.constant 0 : index
    %105 = vector.load %arg2[%c0_34, %c0_35] : memref<128x512xf32, #tpu.memory_space<vmem>>, vector<128x512xf32>
    %cst_36 = arith.constant dense<0.000000e+00> : vector<8x512xf32>
    %106 = tpu.matmul %100, %105, %cst_36 {dimension_numbers = #tpu.dot_dimension_numbers<[1], [0], [0], [1], [0, 0, 1, 1], [], []>} : vector<8x128xf32>, vector<128x512xf32>, vector<8x512xf32> -> vector<8x512xf32>
    %107 = arith.addf %104, %106 : vector<8x512xf32>
    %108 = vector.extract_strided_slice %107 {offsets = [0, 0], sizes = [8, 384], strides = [1, 1]} : vector<8x512xf32> to vector<8x384xf32>
    %109 = arith.negf %108 : vector<8x384xf32>
    %110 = math.exp %109 : vector<8x384xf32>
    %cst_37 = arith.constant 1.000000e+00 : f32
    %111 = vector.broadcast %cst_37 : f32 to vector<8x384xf32>
    %112 = arith.addf %111, %110 : vector<8x384xf32>
    %113 = arith.divf %111, %112 : vector<8x384xf32>
    %114 = vector.extract_strided_slice %107 {offsets = [0, 384], sizes = [8, 128], strides = [1, 1]} : vector<8x512xf32> to vector<8x128xf32>
    %115 = math.tanh %114 : vector<8x128xf32>
    %116 = vector.extract_strided_slice %113 {offsets = [0, 0], sizes = [8, 128], strides = [1, 1]} : vector<8x384xf32> to vector<8x128xf32>
    %117 = vector.extract_strided_slice %113 {offsets = [0, 128], sizes = [8, 128], strides = [1, 1]} : vector<8x384xf32> to vector<8x128xf32>
    %118 = vector.extract_strided_slice %113 {offsets = [0, 256], sizes = [8, 128], strides = [1, 1]} : vector<8x384xf32> to vector<8x128xf32>
    %119 = arith.mulf %117, %98 : vector<8x128xf32>
    %120 = arith.mulf %116, %115 : vector<8x128xf32>
    %121 = arith.addf %119, %120 : vector<8x128xf32>
    %122 = math.tanh %121 : vector<8x128xf32>
    %123 = arith.mulf %118, %122 : vector<8x128xf32>
    %c5_i32 = arith.constant 5 : i32
    %c8_i32_38 = arith.constant 8 : i32
    %124 = arith.muli %c5_i32, %c8_i32_38 : i32
    %125 = tpu.assume_multiple %124, 8 : i32
    %126 = arith.index_cast %125 : i32 to index
    %c0_39 = arith.constant 0 : index
    %127 = vector.load %arg7[%126, %c0_39] : memref<64x512xf32, #tpu.memory_space<vmem>>, vector<8x512xf32>
    %c0_40 = arith.constant 0 : index
    %c0_41 = arith.constant 0 : index
    %128 = vector.load %arg2[%c0_40, %c0_41] : memref<128x512xf32, #tpu.memory_space<vmem>>, vector<128x512xf32>
    %cst_42 = arith.constant dense<0.000000e+00> : vector<8x512xf32>
    %129 = tpu.matmul %123, %128, %cst_42 {dimension_numbers = #tpu.dot_dimension_numbers<[1], [0], [0], [1], [0, 0, 1, 1], [], []>} : vector<8x128xf32>, vector<128x512xf32>, vector<8x512xf32> -> vector<8x512xf32>
    %130 = arith.addf %127, %129 : vector<8x512xf32>
    %131 = vector.extract_strided_slice %130 {offsets = [0, 0], sizes = [8, 384], strides = [1, 1]} : vector<8x512xf32> to vector<8x384xf32>
    %132 = arith.negf %131 : vector<8x384xf32>
    %133 = math.exp %132 : vector<8x384xf32>
    %cst_43 = arith.constant 1.000000e+00 : f32
    %134 = vector.broadcast %cst_43 : f32 to vector<8x384xf32>
    %135 = arith.addf %134, %133 : vector<8x384xf32>
    %136 = arith.divf %134, %135 : vector<8x384xf32>
    %137 = vector.extract_strided_slice %130 {offsets = [0, 384], sizes = [8, 128], strides = [1, 1]} : vector<8x512xf32> to vector<8x128xf32>
    %138 = math.tanh %137 : vector<8x128xf32>
    %139 = vector.extract_strided_slice %136 {offsets = [0, 0], sizes = [8, 128], strides = [1, 1]} : vector<8x384xf32> to vector<8x128xf32>
    %140 = vector.extract_strided_slice %136 {offsets = [0, 128], sizes = [8, 128], strides = [1, 1]} : vector<8x384xf32> to vector<8x128xf32>
    %141 = vector.extract_strided_slice %136 {offsets = [0, 256], sizes = [8, 128], strides = [1, 1]} : vector<8x384xf32> to vector<8x128xf32>
    %142 = arith.mulf %140, %121 : vector<8x128xf32>
    %143 = arith.mulf %139, %138 : vector<8x128xf32>
    %144 = arith.addf %142, %143 : vector<8x128xf32>
    %145 = math.tanh %144 : vector<8x128xf32>
    %146 = arith.mulf %141, %145 : vector<8x128xf32>
    %c6_i32 = arith.constant 6 : i32
    %c8_i32_44 = arith.constant 8 : i32
    %147 = arith.muli %c6_i32, %c8_i32_44 : i32
    %148 = tpu.assume_multiple %147, 8 : i32
    %149 = arith.index_cast %148 : i32 to index
    %c0_45 = arith.constant 0 : index
    %150 = vector.load %arg7[%149, %c0_45] : memref<64x512xf32, #tpu.memory_space<vmem>>, vector<8x512xf32>
    %c0_46 = arith.constant 0 : index
    %c0_47 = arith.constant 0 : index
    %151 = vector.load %arg2[%c0_46, %c0_47] : memref<128x512xf32, #tpu.memory_space<vmem>>, vector<128x512xf32>
    %cst_48 = arith.constant dense<0.000000e+00> : vector<8x512xf32>
    %152 = tpu.matmul %146, %151, %cst_48 {dimension_numbers = #tpu.dot_dimension_numbers<[1], [0], [0], [1], [0, 0, 1, 1], [], []>} : vector<8x128xf32>, vector<128x512xf32>, vector<8x512xf32> -> vector<8x512xf32>
    %153 = arith.addf %150, %152 : vector<8x512xf32>
    %154 = vector.extract_strided_slice %153 {offsets = [0, 0], sizes = [8, 384], strides = [1, 1]} : vector<8x512xf32> to vector<8x384xf32>
    %155 = arith.negf %154 : vector<8x384xf32>
    %156 = math.exp %155 : vector<8x384xf32>
    %cst_49 = arith.constant 1.000000e+00 : f32
    %157 = vector.broadcast %cst_49 : f32 to vector<8x384xf32>
    %158 = arith.addf %157, %156 : vector<8x384xf32>
    %159 = arith.divf %157, %158 : vector<8x384xf32>
    %160 = vector.extract_strided_slice %153 {offsets = [0, 384], sizes = [8, 128], strides = [1, 1]} : vector<8x512xf32> to vector<8x128xf32>
    %161 = math.tanh %160 : vector<8x128xf32>
    %162 = vector.extract_strided_slice %159 {offsets = [0, 0], sizes = [8, 128], strides = [1, 1]} : vector<8x384xf32> to vector<8x128xf32>
    %163 = vector.extract_strided_slice %159 {offsets = [0, 128], sizes = [8, 128], strides = [1, 1]} : vector<8x384xf32> to vector<8x128xf32>
    %164 = vector.extract_strided_slice %159 {offsets = [0, 256], sizes = [8, 128], strides = [1, 1]} : vector<8x384xf32> to vector<8x128xf32>
    %165 = arith.mulf %163, %144 : vector<8x128xf32>
    %166 = arith.mulf %162, %161 : vector<8x128xf32>
    %167 = arith.addf %165, %166 : vector<8x128xf32>
    %168 = math.tanh %167 : vector<8x128xf32>
    %169 = arith.mulf %164, %168 : vector<8x128xf32>
    %c7_i32 = arith.constant 7 : i32
    %c8_i32_50 = arith.constant 8 : i32
    %170 = arith.muli %c7_i32, %c8_i32_50 : i32
    %171 = tpu.assume_multiple %170, 8 : i32
    %172 = arith.index_cast %171 : i32 to index
    %c0_51 = arith.constant 0 : index
    %173 = vector.load %arg7[%172, %c0_51] : memref<64x512xf32, #tpu.memory_space<vmem>>, vector<8x512xf32>
    %c0_52 = arith.constant 0 : index
    %c0_53 = arith.constant 0 : index
    %174 = vector.load %arg2[%c0_52, %c0_53] : memref<128x512xf32, #tpu.memory_space<vmem>>, vector<128x512xf32>
    %cst_54 = arith.constant dense<0.000000e+00> : vector<8x512xf32>
    %175 = tpu.matmul %169, %174, %cst_54 {dimension_numbers = #tpu.dot_dimension_numbers<[1], [0], [0], [1], [0, 0, 1, 1], [], []>} : vector<8x128xf32>, vector<128x512xf32>, vector<8x512xf32> -> vector<8x512xf32>
    %176 = arith.addf %173, %175 : vector<8x512xf32>
    %177 = vector.extract_strided_slice %176 {offsets = [0, 0], sizes = [8, 384], strides = [1, 1]} : vector<8x512xf32> to vector<8x384xf32>
    %178 = arith.negf %177 : vector<8x384xf32>
    %179 = math.exp %178 : vector<8x384xf32>
    %cst_55 = arith.constant 1.000000e+00 : f32
    %180 = vector.broadcast %cst_55 : f32 to vector<8x384xf32>
    %181 = arith.addf %180, %179 : vector<8x384xf32>
    %182 = arith.divf %180, %181 : vector<8x384xf32>
    %183 = vector.extract_strided_slice %176 {offsets = [0, 384], sizes = [8, 128], strides = [1, 1]} : vector<8x512xf32> to vector<8x128xf32>
    %184 = math.tanh %183 : vector<8x128xf32>
    %185 = vector.extract_strided_slice %182 {offsets = [0, 0], sizes = [8, 128], strides = [1, 1]} : vector<8x384xf32> to vector<8x128xf32>
    %186 = vector.extract_strided_slice %182 {offsets = [0, 128], sizes = [8, 128], strides = [1, 1]} : vector<8x384xf32> to vector<8x128xf32>
    %187 = vector.extract_strided_slice %182 {offsets = [0, 256], sizes = [8, 128], strides = [1, 1]} : vector<8x384xf32> to vector<8x128xf32>
    %188 = arith.mulf %186, %167 : vector<8x128xf32>
    %189 = arith.mulf %185, %184 : vector<8x128xf32>
    %190 = arith.addf %188, %189 : vector<8x128xf32>
    %191 = math.tanh %190 : vector<8x128xf32>
    %192 = arith.mulf %187, %191 : vector<8x128xf32>
    %c8_i32_56 = arith.constant 8 : i32
    %c0_57 = arith.constant 0 : index
    %c0_58 = arith.constant 0 : index
    %193 = vector.load %arg4[%c0_57, %c0_58] : memref<128x128xf32, #tpu.memory_space<vmem>>, vector<128x128xf32>
    %cst_59 = arith.constant dense<0.000000e+00> : vector<8x128xf32>
    %194 = tpu.matmul %192, %193, %cst_59 {dimension_numbers = #tpu.dot_dimension_numbers<[1], [0], [0], [1], [0, 0, 1, 1], [], []>} : vector<8x128xf32>, vector<128x128xf32>, vector<8x128xf32> -> vector<8x128xf32>
    %c0_60 = arith.constant 0 : index
    %c0_61 = arith.constant 0 : index
    %195 = vector.load %arg5[%c0_60, %c0_61] : memref<1x128xf32, #tpu.memory_space<vmem>>, vector<1x128xf32>
    %196 = vector.broadcast %195 : vector<1x128xf32> to vector<8x128xf32>
    %197 = arith.addf %194, %196 : vector<8x128xf32>
    %c0_62 = arith.constant 0 : index
    %c0_63 = arith.constant 0 : index
    %198 = vector.load %arg6[%c0_62, %c0_63] : memref<8x128xf32, #tpu.memory_space<vmem>>, vector<8x128xf32>
    tpu.vector_store %arg6[%c0_62, %c0_63], %197 {strides = array<i32>} : memref<8x128xf32, #tpu.memory_space<vmem>>, vector<8x128xf32>,
    return
  }
}

</mosaic_0001>

<bundles_post_ra>
// kernel: tpu_custom_call.1
= control target key start
LH: loop header
LB: loop body
LE: loop exit
PB: predicated region body
PF: predicated region fallthrough
CT: control target
= control target key end

     0   :  { %11 = vsyncpa [#allocation4], 0  ;;  %s3448_s0 = inlined_call_operand.vmem [shape: f32[64,5], index: 0, kind: input, shape index: {}]   ;;  %s3449_s1 = inlined_call_operand.vmem [shape: f32[5,512], index: 1, kind: input, shape index: {}]   ;;  %s3450_s2 = inlined_call_operand.hbm [shape: f32[128,512], index: 2, kind: input, shape index: {}]   ;;  %s3451_s3 = inlined_call_operand.vmem [shape: f32[1,512], index: 3, kind: input, shape index: {}]   ;;  %s3452_s4 = inlined_call_operand.hbm [shape: f32[128,128], index: 4, kind: input, shape index: {}]   ;;  %s3453_s5 = inlined_call_operand.vmem [shape: f32[1,128], index: 5, kind: input, shape index: {}]   ;;  %s3454_s6 = inlined_call_operand.hbm [shape: f32[8,128], index: 6, kind: output, shape index: {}]  }
   0x1   :  { %12 = vsyncpa [#allocation7], 0 }
   0x2   :  { %13 = vsyncpa [#allocation5], 0  ;;  %s2886_s21 = smov [#allocation3]   ;;  %s2814_s25 = scalar_lea.hbm %s3450_s2, 8192 }
   0x3   :  { %s23_s22 = sshll.u32 %s2886_s21, 4  ;;  %p2815_p0 = scmp.ne.s32.totalorder %s3450_s2, %s2814_s25  ;;  %s24_s22 = int_to_ptr.vmem [resolvable:$true] %s23_s22 }
   0x4   :  { %p2818_p1 = scmp.lt.u32.totalorder %s2814_s25, %s3450_s2 }
   0x6   :  { %p2820_p2 = pnand %p2818_p1, %p2815_p0 }
   0x8   :  { %2823 = shalt.err (!%p2820_p2)
}
   0x9   :  { %s2824_s30 = scalar_lea.vmem %s24_s22, 8192  ;;  %p2829_p4 = scmp.lt.s32.totalorder %s24_s22, %s24_s22 }
   0xa   :  { %p2825_p3 = scmp.ne.s32.totalorder %s24_s22, %s2824_s30  ;;  %p2830_p5 = scmp.lt.s32.totalorder %s2824_s30, %s2824_s30 }
   0xc   :  { %p2831_p6 = por %p2830_p5, %p2829_p4 }
   0xe   :  { %p2832_p7 = pnand %p2831_p6, %p2825_p3 }
  0x10   :  { %2835 = shalt.err (!%p2832_p7)
}
  0x11   :  { %s2887_s7 = smov 512   ;;  %s2888_s8 = smov 32  }
  0x12   :  { %29 = dma.hbm_to_vmem [thread:$0]  %s3450_s2, 8192, %s24_s22, [#allocation4], %s2887_s7, %s2887_s7, %s2888_s8  }
  0x13   :  { %s2889_s11 = smov [#allocation6]   ;;  %s2836_s15 = scalar_lea.hbm %s3452_s4, 2048 }
  0x14   :  { %s37_s12 = sshll.u32 %s2889_s11, 4  ;;  %p2837_p8 = scmp.ne.s32.totalorder %s3452_s4, %s2836_s15  ;;  %s38_s12 = int_to_ptr.vmem [resolvable:$true] %s37_s12 }
  0x15   :  { %p2840_p9 = scmp.lt.u32.totalorder %s2836_s15, %s3452_s4 }
  0x17   :  { %p2842_p10 = pnand %p2840_p9, %p2837_p8 }
  0x19   :  { %2845 = shalt.err (!%p2842_p10)
}
  0x1a   :  { %s2846_s20 = scalar_lea.vmem %s38_s12, 2048  ;;  %p2851_p12 = scmp.lt.s32.totalorder %s38_s12, %s38_s12 }
  0x1b   :  { %p2847_p11 = scmp.ne.s32.totalorder %s38_s12, %s2846_s20  ;;  %p2852_p13 = scmp.lt.s32.totalorder %s2846_s20, %s2846_s20 }
  0x1d   :  { %p2853_p0 = por %p2852_p13, %p2851_p12 }
  0x1f   :  { %p2854_p1 = pnand %p2853_p0, %p2847_p11 }
  0x21   :  { %2857 = shalt.err (!%p2854_p1)
}
  0x22   :  { %s2890_s2 = smov 128   ;;  %s2891_s21 = smov 8  }
  0x23   :  { %43 = dma.hbm_to_vmem [thread:$0]  %s3452_s4, 2048, %s38_s12, [#allocation7], %s2890_s2, %s2890_s2, %s2891_s21  }
  0x24   :  { %2880 = dma.done.wait [#allocation4], 8192  }
  0x25   :  { %2881 = vsyncadd [#allocation4], 4294959104 }
  0x26   :  { %2882 = dma.done.wait [#allocation7], 2048  }
  0x27   :  { %2883 = vsyncadd [#allocation7], 4294965248  ;;  %v2892_v0 = vmov 0.0   ;;  %vm111_vm0 = vcmask 1044480   ;;  %vm86_vm1 = vcmask 39936   ;;  %v52_v5 = vld [vmem:[%s3448_s0] sm:$0xff] }
  0x28   :  { %188 = vmatprep.mubr.f32.mxu0 %v2892_v0  ;;  %301 = vmatprep.mubr.f32.mxu1 %v2892_v0  ;;  %v61_v1 = vld [vmem:[%s3449_s1 + $0x8] sm:$0x1f]  ;;  %v63_v2 = vld [vmem:[%s3449_s1 + $0x18] sm:$0x1f]  ;;  %v60_v3 = vld [vmem:[%s3449_s1] sm:$0x1f] }
  0x29   :  { %1979 = vmatprep.subr.msk.mxu0 %vm111_vm0, %v61_v1  ;;  %1989 = vmatprep.subr.msk.mxu1 %vm111_vm0, %v63_v2  ;;  %v62_v4 = vld [vmem:[%s3449_s1 + $0x10] sm:$0x1f]  ;;  %v390_v6 = vld [vmem:[#allocation3 + $0x8] sm:$0xff]  ;;  %v392_v8 = vld [vmem:[#allocation3 + $0x18] sm:$0xff]  ;;  %vm2894_vm2 = vmmov 0   ;;  %s2895_s23 = smov [#allocation8]  }
  0x2a   :  { %1980 = vmatpush1.msk.msra.mxu0 %vm111_vm0, %v60_v3  ;;  %1990 = vmatpush1.msk.msra.mxu1 %vm111_vm0, %v62_v4  ;;  %v394_v7 = vld [vmem:[#allocation3 + $0x28] sm:$0xff]  ;;  %v396_v9 = vld [vmem:[#allocation3 + $0x38] sm:$0xff]  ;;  %v389_v12 = vld [vmem:[#allocation3] sm:$0xff]  ;;  %s1962_s24 = sshll.u32 %s2895_s23, 4  ;;  %s1963_s24 = int_to_ptr.vmem [resolvable:$true] %s1962_s24 }
  0x2b   :  { %1981 = vmatmul.mubr.msk.f32.vlgmr.msra.gmra.mrb[0].mxu0 %vm86_vm1, %v52_v5  ;;  %1991 = vmatmul.mubr.msk.f32.vlgmr.msra.gmra.mrb[0].mxu1 %vm86_vm1, %v52_v5  ;;  %v2974_v10 = vpack.c.bf16 %v394_v7, %v390_v6  ;;  %v2976_v11 = vpack.c.bf16 %v396_v9, %v392_v8  ;;  %v393_v13 = vld [vmem:[#allocation3 + $0x20] sm:$0xff]  ;;  %v391_v14 = vld [vmem:[#allocation3 + $0x10] sm:$0xff]  ;;  %v53_v17 = vld [vmem:[%s3448_s0 + $0x8] sm:$0xff]  ;;  %s2858_s25 = scalar_lea.vmem %s1963_s24, 128  ;;  %p2863_p3 = scmp.lt.s32.totalorder %s1963_s24, %s1963_s24 }
  0x2c   :  { %v2978_v15 = vpack.c.bf16 %v393_v13, %v389_v12  ;;  %v395_v16 = vld [vmem:[#allocation3 + $0x30] sm:$0xff]  ;;  %194 = vmatprep.mubr.f32.mxu0 %v2892_v0  ;;  %307 = vmatprep.mubr.f32.mxu1 %v2892_v0  ;;  %v398_v18 = vld [vmem:[#allocation3 + $0x48] sm:$0xff]  ;;  %v400_v21 = vld [vmem:[#allocation3 + $0x58] sm:$0xff]  ;;  %p2859_p2 = scmp.ne.s32.totalorder %s1963_s24, %s2858_s25  ;;  %p2864_p4 = scmp.lt.s32.totalorder %s2858_s25, %s2858_s25 }
  0x2d   :  { %2077 = vmatprep.subr.bf16.mxu0 %v2974_v10  ;;  %2109 = vmatprep.subr.bf16.mxu1 %v2976_v11  ;;  %v2987_v19 = vpack.c.bf16 %v395_v16, %v391_v14  ;;  %v402_v20 = vld [vmem:[#allocation3 + $0x68] sm:$0xff]  ;;  %v404_v22 = vld [vmem:[#allocation3 + $0x78] sm:$0xff]  ;;  %v397_v25 = vld [vmem:[#allocation3 + $0x40] sm:$0xff] }
  0x2e   :  { %2079 = vmatpush1.bf16.msra.mxu0 %v2978_v15  ;;  %v2990_v23 = vpack.c.bf16 %v402_v20, %v398_v18  ;;  %v2992_v24 = vpack.c.bf16 %v404_v22, %v400_v21  ;;  %v401_v26 = vld [vmem:[#allocation3 + $0x60] sm:$0xff]  ;;  %v399_v27 = vld [vmem:[#allocation3 + $0x50] sm:$0xff]  ;;  %v406_v31 = vld [vmem:[#allocation3 + $0x88] sm:$0xff]  ;;  %p2865_p5 = por %p2864_p4, %p2863_p3 }
  0x2f   :  { %2111 = vmatpush1.bf16.msra.mxu1 %v2987_v19  ;;  %1982 = vmatmul.mubr.msk.f32.gmra.mrb[2].mxu0 %vm86_vm1, %v53_v17  ;;  %v2996_v28 = vpack.c.bf16 %v401_v26, %v397_v25  ;;  %v403_v29 = vld [vmem:[#allocation3 + $0x70] sm:$0xff]  ;;  %v410_v33 = vld [vmem:[#allocation3 + $0xa8] sm:$0xff]  ;;  %v408_v34 = vld [vmem:[#allocation3 + $0x98] sm:$0xff] }
  0x30   :  { %v54_v30 = vld [vmem:[%s3448_s0 + $0x10] sm:$0xff]  ;;  %1992 = vmatmul.mubr.msk.f32.gmra.mrb[2].mxu1 %vm86_vm1, %v53_v17  ;;  %2081 = vmatprep.subr.bf16.mxu0 %v2990_v23  ;;  %v3003_v32 = vpack.c.bf16 %v403_v29, %v399_v27  ;;  %v412_v35 = vld [vmem:[#allocation3 + $0xb8] sm:$0xff]  ;;  %v3007_v36 = vpack.c.bf16 %v410_v33, %v406_v31  ;;  %v405_v38 = vld [vmem:[#allocation3 + $0x80] sm:$0xff]  ;;  %p2866_p6 = pnand %p2865_p5, %p2859_p2 }
  0x31   :  { %2113 = vmatprep.subr.bf16.mxu1 %v2992_v24  ;;  %200 = vmatprep.mubr.f32.mxu0 %v2892_v0  ;;  %v3009_v37 = vpack.c.bf16 %v412_v35, %v408_v34  ;;  %v409_v39 = vld [vmem:[#allocation3 + $0xa0] sm:$0xff]  ;;  %v407_v40 = vld [vmem:[#allocation3 + $0x90] sm:$0xff]  ;;  %v55_v43 = vld [vmem:[%s3448_s0 + $0x18] sm:$0xff] }
  0x32   :  { %2083 = vmatpush1.bf16.msra.mxu0 %v2996_v28  ;;  %313 = vmatprep.mubr.f32.mxu1 %v2892_v0  ;;  %v3013_v41 = vpack.c.bf16 %v409_v39, %v405_v38  ;;  %v411_v42 = vld [vmem:[#allocation3 + $0xb0] sm:$0xff]  ;;  %v414_v44 = vld [vmem:[#allocation3 + $0xc8] sm:$0xff]  ;;  %v416_v47 = vld [vmem:[#allocation3 + $0xd8] sm:$0xff] }
  0x33   :  { %2115 = vmatpush1.bf16.msra.mxu1 %v3003_v32  ;;  %1983 = vmatmul.mubr.msk.f32.gmra.mrb[4].mxu0 %vm86_vm1, %v54_v30  ;;  %v3020_v45 = vpack.c.bf16 %v411_v42, %v407_v40  ;;  %v418_v46 = vld [vmem:[#allocation3 + $0xe8] sm:$0xff]  ;;  %v420_v48 = vld [vmem:[#allocation3 + $0xf8] sm:$0xff]  ;;  %v413_v50 = vld [vmem:[#allocation3 + $0xc0] sm:$0xff] }
  0x34   :  { %1993 = vmatmul.mubr.msk.f32.gmra.mrb[4].mxu1 %vm86_vm1, %v54_v30  ;;  %2085 = vmatprep.subr.bf16.mxu0 %v3007_v36  ;;  %v3024_v49 = vpack.c.bf16 %v418_v46, %v414_v44  ;;  %v417_v51 = vld [vmem:[#allocation3 + $0xe0] sm:$0xff]  ;;  %v415_v52 = vld [vmem:[#allocation3 + $0xd0] sm:$0xff]  ;;  %v3028_v53 = vpack.c.bf16 %v420_v48, %v416_v47  ;;  %v422_v55 = vld [vmem:[#allocation3 + $0x108] sm:$0xff] }
  0x35   :  { %2117 = vmatprep.subr.bf16.mxu1 %v3009_v37  ;;  %206 = vmatprep.mubr.f32.mxu0 %v2892_v0  ;;  %v419_v54 = vld [vmem:[#allocation3 + $0xf0] sm:$0xff]  ;;  %v3032_v56 = vpack.c.bf16 %v417_v51, %v413_v50  ;;  %v426_v57 = vld [vmem:[#allocation3 + $0x128] sm:$0xff]  ;;  %v424_v58 = vld [vmem:[#allocation3 + $0x118] sm:$0xff] }
  0x36   :  { %2087 = vmatpush1.bf16.msra.mxu0 %v3013_v41  ;;  %319 = vmatprep.mubr.f32.mxu1 %v2892_v0  ;;  %v428_v59 = vld [vmem:[#allocation3 + $0x138] sm:$0xff]  ;;  %v3036_v60 = vpack.c.bf16 %v419_v54, %v415_v52  ;;  %v421_v61 = vld [vmem:[#allocation3 + $0x100] sm:$0xff]  ;;  %v3043_v1 = vpack.c.bf16 %v426_v57, %v422_v55  ;;  %v423_v2 = vld [vmem:[#allocation3 + $0x110] sm:$0xff] }
  0x37   :  { %2119 = vmatpush1.bf16.msra.mxu1 %v3020_v45  ;;  %1984 = vmatmul.mubr.msk.f32.gmra.mrb[6].mxu0 %vm86_vm1, %v55_v43  ;;  %v425_v62 = vld [vmem:[#allocation3 + $0x120] sm:$0xff]  ;;  %v427_v3 = vld [vmem:[#allocation3 + $0x130] sm:$0xff]  ;;  %v3047_v4 = vpack.c.bf16 %v428_v59, %v424_v58  ;;  %v430_v5 = vld [vmem:[#allocation3 + $0x148] sm:$0xff] }
  0x38   :  { %1994 = vmatmul.mubr.msk.f32.gmra.mrb[6].mxu1 %vm86_vm1, %v55_v43  ;;  %2089 = vmatprep.subr.bf16.mxu0 %v3024_v49  ;;  %v56_v63 = vld [vmem:[%s3448_s0 + $0x20] sm:$0xff]  ;;  %v434_v6 = vld [vmem:[#allocation3 + $0x168] sm:$0xff]  ;;  %v3051_v7 = vpack.c.bf16 %v425_v62, %v421_v61  ;;  %v432_v8 = vld [vmem:[#allocation3 + $0x158] sm:$0xff]  ;;  %v3055_v12 = vpack.c.bf16 %v427_v3, %v423_v2  ;;  %v66_v62 = vlaneseq }
  0x39   :  { %2121 = vmatprep.subr.bf16.mxu1 %v3028_v53  ;;  %212 = vmatprep.mubr.f32.mxu0 %v2892_v0  ;;  %v436_v9 = vld [vmem:[#allocation3 + $0x178] sm:$0xff]  ;;  %v429_v13 = vld [vmem:[#allocation3 + $0x140] sm:$0xff]  ;;  %v57_v16 = vld [vmem:[%s3448_s0 + $0x28] sm:$0xff]  ;;  %v3062_v17 = vpack.c.bf16 %v434_v6, %v430_v5 }
  0x3a   :  { %2091 = vmatpush1.bf16.msra.mxu0 %v3032_v56  ;;  %325 = vmatprep.mubr.f32.mxu1 %v2892_v0  ;;  %v433_v14 = vld [vmem:[#allocation3 + $0x160] sm:$0xff]  ;;  %v431_v18 = vld [vmem:[#allocation3 + $0x150] sm:$0xff]  ;;  %v3066_v21 = vpack.c.bf16 %v436_v9, %v432_v8  ;;  %v438_v22 = vld [vmem:[#allocation3 + $0x188] sm:$0xff] }
  0x3b   :  { %2123 = vmatpush1.bf16.msra.mxu1 %v3036_v60  ;;  %1985 = vmatmul.mubr.msk.f32.gmra.mrb[8].mxu0 %vm86_vm1, %v56_v63  ;;  %v435_v20 = vld [vmem:[#allocation3 + $0x170] sm:$0xff]  ;;  %v442_v25 = vld [vmem:[#allocation3 + $0x1a8] sm:$0xff]  ;;  %v3070_v26 = vpack.c.bf16 %v433_v14, %v429_v13  ;;  %v440_v27 = vld [vmem:[#allocation3 + $0x198] sm:$0xff] }
  0x3c   :  { %1995 = vmatmul.mubr.msk.f32.gmra.mrb[8].mxu1 %vm86_vm1, %v56_v63  ;;  %2093 = vmatprep.subr.bf16.mxu0 %v3043_v1  ;;  %v444_v29 = vld [vmem:[#allocation3 + $0x1b8] sm:$0xff]  ;;  %v3074_v30 = vpack.c.bf16 %v435_v20, %v431_v18  ;;  %v437_v31 = vld [vmem:[#allocation3 + $0x180] sm:$0xff]  ;;  %v58_v34 = vld [vmem:[%s3448_s0 + $0x30] sm:$0xff]  ;;  %v3081_v35 = vpack.c.bf16 %v442_v25, %v438_v22  ;;  %v67_v63 = vshrl.u32 %v66_v62, 7 }
  0x3d   :  { %2125 = vmatprep.subr.bf16.mxu1 %v3047_v4  ;;  %218 = vmatprep.mubr.f32.mxu0 %v2892_v0  ;;  %v441_v33 = vld [vmem:[#allocation3 + $0x1a0] sm:$0xff]  ;;  %v439_v38 = vld [vmem:[#allocation3 + $0x190] sm:$0xff]  ;;  %v3085_v40 = vpack.c.bf16 %v444_v29, %v440_v27  ;;  %v446_v42 = vld [vmem:[#allocation3 + $0x1c8] sm:$0xff] }
  0x3e   :  { %2095 = vmatpush1.bf16.msra.mxu0 %v3051_v7  ;;  %331 = vmatprep.mubr.f32.mxu1 %v2892_v0  ;;  %v443_v39 = vld [vmem:[#allocation3 + $0x1b0] sm:$0xff]  ;;  %v450_v43 = vld [vmem:[#allocation3 + $0x1e8] sm:$0xff]  ;;  %v3089_v44 = vpack.c.bf16 %v441_v33, %v437_v31  ;;  %v448_v46 = vld [vmem:[#allocation3 + $0x1d8] sm:$0xff]  ;;  %v68_v2 = vsub.s32 0, %v67_v63  ;;  %v72_v5 = vsub.s32 1, %v67_v63  ;;  %v76_v13 = vsub.s32 2, %v67_v63 }
  0x3f   :  { %2127 = vmatpush1.bf16.msra.mxu1 %v3055_v12  ;;  %1986 = vmatmul.mubr.msk.f32.gmra.mrb[10].mxu0 %vm86_vm1, %v57_v16  ;;  %v452_v47 = vld [vmem:[#allocation3 + $0x1f8] sm:$0xff]  ;;  %v3093_v48 = vpack.c.bf16 %v443_v39, %v439_v38  ;;  %v445_v50 = vld [vmem:[#allocation3 + $0x1c0] sm:$0xff]  ;;  %v3100_v54 = vpack.c.bf16 %v450_v43, %v446_v42  ;;  %v447_v55 = vld [vmem:[#allocation3 + $0x1d0] sm:$0xff]  ;;  %v80_v31 = vsub.s32 3, %v67_v63 }
  0x40   :  { %1996 = vmatmul.mubr.msk.f32.gmra.mrb[10].mxu1 %vm86_vm1, %v57_v16  ;;  %2097 = vmatprep.subr.bf16.mxu0 %v3062_v17  ;;  %v449_v51 = vld [vmem:[#allocation3 + $0x1e0] sm:$0xff]  ;;  %v59_v52 = vld [vmem:[%s3448_s0 + $0x38] sm:$0xff]  ;;  %v451_v57 = vld [vmem:[#allocation3 + $0x1f0] sm:$0xff]  ;;  %v3104_v58 = vpack.c.bf16 %v452_v47, %v448_v46 }
  0x41   :  { %2129 = vmatprep.subr.bf16.mxu1 %v3066_v21  ;;  %224 = vmatprep.mubr.f32.mxu0 %v2892_v0  ;;  %v3108_v59 = vpack.c.bf16 %v449_v51, %v445_v50  ;;  %v3112_v61 = vpack.c.bf16 %v451_v57, %v447_v55  ;;  %v64_v3 = vld [vmem:[%s3451_s3] sm:$0xf] }
  0x42   :  { %2099 = vmatpush1.bf16.msra.mxu0 %v3070_v26  ;;  %337 = vmatprep.mubr.f32.mxu1 %v2892_v0  ;;  %v3162_v6 = vrot.slane %v64_v3, %v68_v2  ;;  %v3164_v8 = vrot.slane %v64_v3, %v72_v5  ;;  %v3168_v27 = vrot.slane %v64_v3, %v76_v13 }
  0x43   :  { %2131 = vmatpush1.bf16.msra.mxu1 %v3074_v30  ;;  %1987 = vmatmul.mubr.msk.f32.gmra.mrb[12].mxu0 %vm86_vm1, %v58_v34 }
  0x44   :  { %1997 = vmatmul.mubr.msk.f32.gmra.mrb[12].mxu1 %vm86_vm1, %v58_v34  ;;  %2101 = vmatprep.subr.bf16.mxu0 %v3081_v35  ;;  %v3171_v34 = vrot.slane %v64_v3, %v80_v31 }
  0x45   :  { %2133 = vmatprep.subr.bf16.mxu1 %v3085_v40  ;;  %230 = vmatprep.mubr.f32.mxu0 %v2892_v0 }
  0x46   :  { %2103 = vmatpush1.bf16.msra.mxu0 %v3089_v44  ;;  %343 = vmatprep.mubr.f32.mxu1 %v2892_v0 }
  0x47   :  { %2135 = vmatpush1.bf16.msra.mxu1 %v3093_v48  ;;  %1988 = vmatmul.mubr.msk.f32.gmra.mrb[14].mxu0 %vm86_vm1, %v59_v52 }
  0x48   :  { %1998 = vmatmul.mubr.msk.f32.gmra.mrb[14].mxu1 %vm86_vm1, %v59_v52  ;;  %2105 = vmatprep.subr.bf16.mxu0 %v3100_v54 }
  0x49   :  { %2137 = vmatprep.subr.bf16.mxu1 %v3104_v58  ;;  %517 = vmatprep.mubr.f32.mxu0 %v2892_v0 }
  0x4a   :  { %2107 = vmatpush1.bf16.msra.mxu0 %v3108_v59  ;;  %588 = vmatprep.mubr.f32.mxu1 %v2892_v0 }
  0x4b   :  { %2139 = vmatpush1.bf16.msra.mxu1 %v3112_v61  ;;  %2141 = vmatprep.subr.bf16.mxu0 %v2974_v10 }
  0x4c   :  { %2173 = vmatprep.subr.bf16.mxu1 %v2976_v11 }
  0x4d   :  { %518 = vmatmul.mubr.f32.vlgmr.msra.gmra.mrb[0].mxu0 %v2892_v0 }
  0x4e   :  { %589 = vmatmul.mubr.f32.vlgmr.msra.gmra.mrb[0].mxu1 %v2892_v0  ;;  %2143 = vmatpush1.bf16.msra.mxu0 %v2978_v15 }
  0x4f   :  { %2175 = vmatpush1.bf16.msra.mxu1 %v2987_v19  ;;  %2145 = vmatprep.subr.bf16.mxu0 %v2990_v23 }
  0x50   :  { %2177 = vmatprep.subr.bf16.mxu1 %v2992_v24  ;;  %694 = vmatprep.mubr.f32.mxu0 %v2892_v0 }
  0x51   :  { %765 = vmatprep.mubr.f32.mxu1 %v2892_v0 }
  0x52   :  { %2147 = vmatpush1.bf16.msra.mxu0 %v2996_v28 }
  0x53   :  { %2179 = vmatpush1.bf16.msra.mxu1 %v3003_v32  ;;  %2149 = vmatprep.subr.bf16.mxu0 %v3007_v36 }
  0x54   :  { %2181 = vmatprep.subr.bf16.mxu1 %v3009_v37 }
  0x56   :  { %2151 = vmatpush1.bf16.msra.mxu0 %v3013_v41 }
  0x57   :  { %2183 = vmatpush1.bf16.msra.mxu1 %v3020_v45  ;;  %2153 = vmatprep.subr.bf16.mxu0 %v3024_v49 }
  0x58   :  { %2185 = vmatprep.subr.bf16.mxu1 %v3028_v53 }
  0x5a   :  { %2155 = vmatpush1.bf16.msra.mxu0 %v3032_v56 }
  0x5b   :  { %2187 = vmatpush1.bf16.msra.mxu1 %v3036_v60  ;;  %2157 = vmatprep.subr.bf16.mxu0 %v3043_v1 }
  0x5c   :  { %2189 = vmatprep.subr.bf16.mxu1 %v3047_v4 }
  0x5e   :  { %2159 = vmatpush1.bf16.msra.mxu0 %v3051_v7 }
  0x5f   :  { %2191 = vmatpush1.bf16.msra.mxu1 %v3055_v12  ;;  %2161 = vmatprep.subr.bf16.mxu0 %v3062_v17 }
  0x60   :  { %2193 = vmatprep.subr.bf16.mxu1 %v3066_v21 }
  0x62   :  { %2163 = vmatpush1.bf16.msra.mxu0 %v3070_v26 }
  0x63   :  { %2195 = vmatpush1.bf16.msra.mxu1 %v3074_v30  ;;  %2165 = vmatprep.subr.bf16.mxu0 %v3081_v35 }
  0x64   :  { %2197 = vmatprep.subr.bf16.mxu1 %v3085_v40 }
  0x66   :  { %2167 = vmatpush1.bf16.msra.mxu0 %v3089_v44 }
  0x67   :  { %2199 = vmatpush1.bf16.msra.mxu1 %v3093_v48  ;;  %2169 = vmatprep.subr.bf16.mxu0 %v3100_v54 }
  0x68   :  { %2201 = vmatprep.subr.bf16.mxu1 %v3104_v58 }
  0x6a   :  { %2171 = vmatpush1.bf16.msra.mxu0 %v3108_v59 }
  0x6b   :  { %2203 = vmatpush1.bf16.msra.mxu1 %v3112_v61  ;;  %2205 = vmatprep.subr.bf16.mxu0 %v2974_v10 }
  0x6c   :  { %2237 = vmatprep.subr.bf16.mxu1 %v2976_v11 }
 0x120   :  { %v519_v9 = vpop.f32.mrb[0].mxu0 }
 0x121   :  { %v2612_v14 = vadd.f32 %v519_v9, %v3162_v6  ;;  %v590_v16 = vpop.f32.mrb[0].mxu1  ;;  %v521_v18 = vpop.f32.mrb[1].mxu0 }
 0x122   :  { %v2613_v20 = vadd.f32 %v521_v18, %v3164_v8  ;;  %v592_v22 = vpop.f32.mrb[1].mxu1  ;;  %v2628_v33 = vadd.f32 %v590_v16, %v3168_v27 }
 0x123   :  { %v1999_v25 = vmul.f32 -1.442695, %v2612_v14  ;;  %v2629_v39 = vadd.f32 %v592_v22, %v3171_v34 }
 0x124   :  { %v2000_v29 = vmul.f32 -1.442695, %v2613_v20  ;;  %v2001_v38 = vmul.f32 -1.442695, %v2628_v33 }
 0x125   :  { %2686 = vpow2.f32 %v1999_v25 }
 0x126   :  { %2688 = vpow2.f32 %v2000_v29 }
 0x127   :  { %2690 = vpow2.f32 %v2001_v38 }
 0x128   :  { %2692 = vtanh.f32 %v2629_v39 }
 0x12f   :  { %v2687_v42 = vpop.eup %2686 }
 0x130   :  { %v608_v43 = vadd.f32 1.0, %v2687_v42  ;;  %v2689_v46 = vpop.eup %2688 }
 0x131   :  { %v609_v47 = vadd.f32 1.0, %v2689_v46  ;;  %v2691_v50 = vpop.eup %2690 }
 0x132   :  { %2694 = vrcp.f32 %v608_v43  ;;  %v2693_v51 = vpop.eup %2692  ;;  %v610_v62 = vadd.f32 1.0, %v2691_v50 }
 0x133   :  { %2696 = vrcp.f32 %v609_v47 }
 0x134   :  { %2698 = vrcp.f32 %v610_v62 }
 0x13c   :  { %v2695_v52 = vpop.eup %2694 }
 0x13d   :  { %v619_v55 = vmul.f32 %v2695_v52, %v2693_v51  ;;  %v2697_v57 = vpop.eup %2696 }
 0x13e   :  { %v618_v63 = vmul.f32 0.0, %v2697_v57  ;;  %v2699_v3 = vpop.eup %2698 }
 0x140   :  { %v3174_v2 = vadd.f32 %v619_v55, %v618_v63 }
 0x142   :  { %2700 = vtanh.f32 %v3174_v2 }
 0x14c   :  { %v2701_v5 = vpop.eup %2700 }
 0x14d   :  { %v622_v9 = vmul.f32 %v2701_v5, %v2699_v3 }
 0x14f   :  { %695 = vmatmul.mubr.f32.vlgmr.msra.gmra.mrb[2].mxu0 %v622_v9  ;;  %766 = vmatmul.mubr.f32.vlgmr.msra.gmra.mrb[2].mxu1 %v622_v9 }
 0x150   :  { %2207 = vmatpush1.bf16.msra.mxu0 %v2978_v15  ;;  %2239 = vmatpush1.bf16.msra.mxu1 %v2987_v19 }
 0x151   :  { %2209 = vmatprep.subr.bf16.mxu0 %v2990_v23  ;;  %2241 = vmatprep.subr.bf16.mxu1 %v2992_v24 }
 0x152   :  { %871 = vmatprep.mubr.f32.mxu0 %v2892_v0  ;;  %942 = vmatprep.mubr.f32.mxu1 %v2892_v0 }
 0x154   :  { %2211 = vmatpush1.bf16.msra.mxu0 %v2996_v28  ;;  %2243 = vmatpush1.bf16.msra.mxu1 %v3003_v32 }
 0x155   :  { %2213 = vmatprep.subr.bf16.mxu0 %v3007_v36  ;;  %2245 = vmatprep.subr.bf16.mxu1 %v3009_v37 }
 0x158   :  { %2215 = vmatpush1.bf16.msra.mxu0 %v3013_v41  ;;  %2247 = vmatpush1.bf16.msra.mxu1 %v3020_v45 }
 0x159   :  { %2217 = vmatprep.subr.bf16.mxu0 %v3024_v49  ;;  %2249 = vmatprep.subr.bf16.mxu1 %v3028_v53 }
 0x15c   :  { %2219 = vmatpush1.bf16.msra.mxu0 %v3032_v56  ;;  %2251 = vmatpush1.bf16.msra.mxu1 %v3036_v60 }
 0x15d   :  { %2221 = vmatprep.subr.bf16.mxu0 %v3043_v1  ;;  %2253 = vmatprep.subr.bf16.mxu1 %v3047_v4 }
 0x160   :  { %2223 = vmatpush1.bf16.msra.mxu0 %v3051_v7  ;;  %2255 = vmatpush1.bf16.msra.mxu1 %v3055_v12 }
 0x161   :  { %2225 = vmatprep.subr.bf16.mxu0 %v3062_v17  ;;  %2257 = vmatprep.subr.bf16.mxu1 %v3066_v21 }
 0x164   :  { %2227 = vmatpush1.bf16.msra.mxu0 %v3070_v26  ;;  %2259 = vmatpush1.bf16.msra.mxu1 %v3074_v30 }
 0x165   :  { %2229 = vmatprep.subr.bf16.mxu0 %v3081_v35  ;;  %2261 = vmatprep.subr.bf16.mxu1 %v3085_v40 }
 0x168   :  { %2231 = vmatpush1.bf16.msra.mxu0 %v3089_v44  ;;  %2263 = vmatpush1.bf16.msra.mxu1 %v3093_v48 }
 0x169   :  { %2233 = vmatprep.subr.bf16.mxu0 %v3100_v54  ;;  %2265 = vmatprep.subr.bf16.mxu1 %v3104_v58 }
 0x16c   :  { %2235 = vmatpush1.bf16.msra.mxu0 %v3108_v59  ;;  %2267 = vmatpush1.bf16.msra.mxu1 %v3112_v61 }
 0x16d   :  { %2269 = vmatprep.subr.bf16.mxu0 %v2974_v10  ;;  %2301 = vmatprep.subr.bf16.mxu1 %v2976_v11 }
 0x222   :  { %v696_v13 = vpop.f32.mrb[2].mxu0  ;;  %v767_v14 = vpop.f32.mrb[2].mxu1 }
 0x223   :  { %v2614_v16 = vadd.f32 %v696_v13, %v3162_v6  ;;  %v698_v18 = vpop.f32.mrb[3].mxu0  ;;  %v769_v20 = vpop.f32.mrb[3].mxu1  ;;  %v2630_v31 = vadd.f32 %v767_v14, %v3168_v27 }
 0x224   :  { %v2615_v22 = vadd.f32 %v698_v18, %v3164_v8  ;;  %v2631_v33 = vadd.f32 %v769_v20, %v3171_v34 }
 0x225   :  { %v2002_v25 = vmul.f32 -1.442695, %v2614_v16  ;;  %v2004_v38 = vmul.f32 -1.442695, %v2630_v31 }
 0x226   :  { %v2003_v29 = vmul.f32 -1.442695, %v2615_v22 }
 0x227   :  { %2702 = vpow2.f32 %v2002_v25 }
 0x228   :  { %2704 = vpow2.f32 %v2003_v29 }
 0x229   :  { %2706 = vtanh.f32 %v2631_v33 }
 0x22a   :  { %2708 = vpow2.f32 %v2004_v38 }
 0x231   :  { %v2703_v39 = vpop.eup %2702 }
 0x232   :  { %v785_v42 = vadd.f32 1.0, %v2703_v39  ;;  %v2705_v43 = vpop.eup %2704 }
 0x233   :  { %v786_v46 = vadd.f32 1.0, %v2705_v43  ;;  %v2707_v47 = vpop.eup %2706 }
 0x234   :  { %2710 = vrcp.f32 %v785_v42  ;;  %v2709_v50 = vpop.eup %2708 }
 0x235   :  { %2712 = vrcp.f32 %v786_v46  ;;  %v787_v57 = vadd.f32 1.0, %v2709_v50 }
 0x237   :  { %2714 = vrcp.f32 %v787_v57 }
 0x23e   :  { %v2711_v51 = vpop.eup %2710 }
 0x23f   :  { %v796_v52 = vmul.f32 %v2711_v51, %v2707_v47  ;;  %v2713_v55 = vpop.eup %2712 }
 0x240   :  { %v795_v62 = vmul.f32 %v2713_v55, %v3174_v2 }
 0x241   :  { %v2715_v3 = vpop.eup %2714 }
 0x242   :  { %v3216_v63 = vadd.f32 %v796_v52, %v795_v62 }
 0x244   :  { %2716 = vtanh.f32 %v3216_v63 }
 0x24e   :  { %v2717_v5 = vpop.eup %2716 }
 0x24f   :  { %v799_v9 = vmul.f32 %v2717_v5, %v2715_v3 }
 0x251   :  { %872 = vmatmul.mubr.f32.vlgmr.msra.gmra.mrb[4].mxu0 %v799_v9  ;;  %943 = vmatmul.mubr.f32.vlgmr.msra.gmra.mrb[4].mxu1 %v799_v9 }
 0x252   :  { %2271 = vmatpush1.bf16.msra.mxu0 %v2978_v15  ;;  %2303 = vmatpush1.bf16.msra.mxu1 %v2987_v19 }
 0x253   :  { %2273 = vmatprep.subr.bf16.mxu0 %v2990_v23  ;;  %2305 = vmatprep.subr.bf16.mxu1 %v2992_v24 }
 0x254   :  { %1048 = vmatprep.mubr.f32.mxu0 %v2892_v0  ;;  %1119 = vmatprep.mubr.f32.mxu1 %v2892_v0 }
 0x256   :  { %2275 = vmatpush1.bf16.msra.mxu0 %v2996_v28  ;;  %2307 = vmatpush1.bf16.msra.mxu1 %v3003_v32 }
 0x257   :  { %2277 = vmatprep.subr.bf16.mxu0 %v3007_v36  ;;  %2309 = vmatprep.subr.bf16.mxu1 %v3009_v37 }
 0x25a   :  { %2279 = vmatpush1.bf16.msra.mxu0 %v3013_v41  ;;  %2311 = vmatpush1.bf16.msra.mxu1 %v3020_v45 }
 0x25b   :  { %2281 = vmatprep.subr.bf16.mxu0 %v3024_v49  ;;  %2313 = vmatprep.subr.bf16.mxu1 %v3028_v53 }
 0x25e   :  { %2283 = vmatpush1.bf16.msra.mxu0 %v3032_v56  ;;  %2315 = vmatpush1.bf16.msra.mxu1 %v3036_v60 }
 0x25f   :  { %2285 = vmatprep.subr.bf16.mxu0 %v3043_v1  ;;  %2317 = vmatprep.subr.bf16.mxu1 %v3047_v4 }
 0x262   :  { %2287 = vmatpush1.bf16.msra.mxu0 %v3051_v7  ;;  %2319 = vmatpush1.bf16.msra.mxu1 %v3055_v12 }
 0x263   :  { %2289 = vmatprep.subr.bf16.mxu0 %v3062_v17  ;;  %2321 = vmatprep.subr.bf16.mxu1 %v3066_v21 }
 0x266   :  { %2291 = vmatpush1.bf16.msra.mxu0 %v3070_v26  ;;  %2323 = vmatpush1.bf16.msra.mxu1 %v3074_v30 }
 0x267   :  { %2293 = vmatprep.subr.bf16.mxu0 %v3081_v35  ;;  %2325 = vmatprep.subr.bf16.mxu1 %v3085_v40 }
 0x26a   :  { %2295 = vmatpush1.bf16.msra.mxu0 %v3089_v44  ;;  %2327 = vmatpush1.bf16.msra.mxu1 %v3093_v48 }
 0x26b   :  { %2297 = vmatprep.subr.bf16.mxu0 %v3100_v54  ;;  %2329 = vmatprep.subr.bf16.mxu1 %v3104_v58 }
 0x26e   :  { %2299 = vmatpush1.bf16.msra.mxu0 %v3108_v59  ;;  %2331 = vmatpush1.bf16.msra.mxu1 %v3112_v61 }
 0x26f   :  { %2333 = vmatprep.subr.bf16.mxu0 %v2974_v10  ;;  %2365 = vmatprep.subr.bf16.mxu1 %v2976_v11 }
 0x324   :  { %v873_v2 = vpop.f32.mrb[4].mxu0  ;;  %v944_v13 = vpop.f32.mrb[4].mxu1 }
 0x325   :  { %v2616_v14 = vadd.f32 %v873_v2, %v3162_v6  ;;  %v875_v16 = vpop.f32.mrb[5].mxu0  ;;  %v946_v18 = vpop.f32.mrb[5].mxu1  ;;  %v2632_v29 = vadd.f32 %v944_v13, %v3168_v27 }
 0x326   :  { %v2617_v20 = vadd.f32 %v875_v16, %v3164_v8  ;;  %v2633_v31 = vadd.f32 %v946_v18, %v3171_v34 }
 0x327   :  { %v2005_v22 = vmul.f32 -1.442695, %v2616_v14  ;;  %v2007_v33 = vmul.f32 -1.442695, %v2632_v29 }
 0x328   :  { %v2006_v25 = vmul.f32 -1.442695, %v2617_v20 }
 0x329   :  { %2718 = vpow2.f32 %v2005_v22 }
 0x32a   :  { %2720 = vpow2.f32 %v2006_v25 }
 0x32b   :  { %2722 = vtanh.f32 %v2633_v31 }
 0x32c   :  { %2724 = vpow2.f32 %v2007_v33 }
 0x333   :  { %v2719_v38 = vpop.eup %2718 }
 0x334   :  { %v962_v39 = vadd.f32 1.0, %v2719_v38  ;;  %v2721_v42 = vpop.eup %2720 }
 0x335   :  { %v963_v43 = vadd.f32 1.0, %v2721_v42  ;;  %v2723_v46 = vpop.eup %2722 }
 0x336   :  { %2726 = vrcp.f32 %v962_v39  ;;  %v2725_v47 = vpop.eup %2724 }
 0x337   :  { %2728 = vrcp.f32 %v963_v43  ;;  %v964_v55 = vadd.f32 1.0, %v2725_v47 }
 0x339   :  { %2730 = vrcp.f32 %v964_v55 }
 0x340   :  { %v2727_v50 = vpop.eup %2726 }
 0x341   :  { %v973_v51 = vmul.f32 %v2727_v50, %v2723_v46  ;;  %v2729_v52 = vpop.eup %2728 }
 0x342   :  { %v972_v57 = vmul.f32 %v2729_v52, %v3216_v63 }
 0x343   :  { %v2731_v3 = vpop.eup %2730 }
 0x344   :  { %v3258_v62 = vadd.f32 %v973_v51, %v972_v57 }
 0x346   :  { %2732 = vtanh.f32 %v3258_v62 }
 0x350   :  { %v2733_v5 = vpop.eup %2732 }
 0x351   :  { %v976_v9 = vmul.f32 %v2733_v5, %v2731_v3 }
 0x353   :  { %1049 = vmatmul.mubr.f32.vlgmr.msra.gmra.mrb[6].mxu0 %v976_v9  ;;  %1120 = vmatmul.mubr.f32.vlgmr.msra.gmra.mrb[6].mxu1 %v976_v9 }
 0x354   :  { %2335 = vmatpush1.bf16.msra.mxu0 %v2978_v15  ;;  %2367 = vmatpush1.bf16.msra.mxu1 %v2987_v19 }
 0x355   :  { %2337 = vmatprep.subr.bf16.mxu0 %v2990_v23  ;;  %2369 = vmatprep.subr.bf16.mxu1 %v2992_v24 }
 0x356   :  { %1225 = vmatprep.mubr.f32.mxu0 %v2892_v0  ;;  %1296 = vmatprep.mubr.f32.mxu1 %v2892_v0 }
 0x358   :  { %2339 = vmatpush1.bf16.msra.mxu0 %v2996_v28  ;;  %2371 = vmatpush1.bf16.msra.mxu1 %v3003_v32 }
 0x359   :  { %2341 = vmatprep.subr.bf16.mxu0 %v3007_v36  ;;  %2373 = vmatprep.subr.bf16.mxu1 %v3009_v37 }
 0x35c   :  { %2343 = vmatpush1.bf16.msra.mxu0 %v3013_v41  ;;  %2375 = vmatpush1.bf16.msra.mxu1 %v3020_v45 }
 0x35d   :  { %2345 = vmatprep.subr.bf16.mxu0 %v3024_v49  ;;  %2377 = vmatprep.subr.bf16.mxu1 %v3028_v53 }
 0x360   :  { %2347 = vmatpush1.bf16.msra.mxu0 %v3032_v56  ;;  %2379 = vmatpush1.bf16.msra.mxu1 %v3036_v60 }
 0x361   :  { %2349 = vmatprep.subr.bf16.mxu0 %v3043_v1  ;;  %2381 = vmatprep.subr.bf16.mxu1 %v3047_v4 }
 0x364   :  { %2351 = vmatpush1.bf16.msra.mxu0 %v3051_v7  ;;  %2383 = vmatpush1.bf16.msra.mxu1 %v3055_v12 }
 0x365   :  { %2353 = vmatprep.subr.bf16.mxu0 %v3062_v17  ;;  %2385 = vmatprep.subr.bf16.mxu1 %v3066_v21 }
 0x368   :  { %2355 = vmatpush1.bf16.msra.mxu0 %v3070_v26  ;;  %2387 = vmatpush1.bf16.msra.mxu1 %v3074_v30 }
 0x369   :  { %2357 = vmatprep.subr.bf16.mxu0 %v3081_v35  ;;  %2389 = vmatprep.subr.bf16.mxu1 %v3085_v40 }
 0x36c   :  { %2359 = vmatpush1.bf16.msra.mxu0 %v3089_v44  ;;  %2391 = vmatpush1.bf16.msra.mxu1 %v3093_v48 }
 0x36d   :  { %2361 = vmatprep.subr.bf16.mxu0 %v3100_v54  ;;  %2393 = vmatprep.subr.bf16.mxu1 %v3104_v58 }
 0x370   :  { %2363 = vmatpush1.bf16.msra.mxu0 %v3108_v59  ;;  %2395 = vmatpush1.bf16.msra.mxu1 %v3112_v61 }
 0x371   :  { %2397 = vmatprep.subr.bf16.mxu0 %v2974_v10  ;;  %2429 = vmatprep.subr.bf16.mxu1 %v2976_v11 }
 0x426   :  { %v1050_v63 = vpop.f32.mrb[6].mxu0  ;;  %v1121_v2 = vpop.f32.mrb[6].mxu1 }
 0x427   :  { %v2618_v13 = vadd.f32 %v1050_v63, %v3162_v6  ;;  %v1052_v14 = vpop.f32.mrb[7].mxu0  ;;  %v1123_v16 = vpop.f32.mrb[7].mxu1  ;;  %v2634_v25 = vadd.f32 %v1121_v2, %v3168_v27 }
 0x428   :  { %v2619_v18 = vadd.f32 %v1052_v14, %v3164_v8  ;;  %v2635_v29 = vadd.f32 %v1123_v16, %v3171_v34 }
 0x429   :  { %v2008_v20 = vmul.f32 -1.442695, %v2618_v13  ;;  %v2010_v31 = vmul.f32 -1.442695, %v2634_v25 }
 0x42a   :  { %v2009_v22 = vmul.f32 -1.442695, %v2619_v18 }
 0x42b   :  { %2734 = vpow2.f32 %v2008_v20 }
 0x42c   :  { %2736 = vpow2.f32 %v2009_v22 }
 0x42d   :  { %2738 = vtanh.f32 %v2635_v29 }
 0x42e   :  { %2740 = vpow2.f32 %v2010_v31 }
 0x435   :  { %v2735_v33 = vpop.eup %2734 }
 0x436   :  { %v1139_v38 = vadd.f32 1.0, %v2735_v33  ;;  %v2737_v39 = vpop.eup %2736 }
 0x437   :  { %v1140_v42 = vadd.f32 1.0, %v2737_v39  ;;  %v2739_v43 = vpop.eup %2738 }
 0x438   :  { %2742 = vrcp.f32 %v1139_v38  ;;  %v2741_v46 = vpop.eup %2740 }
 0x439   :  { %2744 = vrcp.f32 %v1140_v42  ;;  %v1141_v52 = vadd.f32 1.0, %v2741_v46 }
 0x43b   :  { %2746 = vrcp.f32 %v1141_v52 }
 0x442   :  { %v2743_v47 = vpop.eup %2742 }
 0x443   :  { %v1150_v50 = vmul.f32 %v2743_v47, %v2739_v43  ;;  %v2745_v51 = vpop.eup %2744 }
 0x444   :  { %v1149_v55 = vmul.f32 %v2745_v51, %v3258_v62 }
 0x445   :  { %v2747_v3 = vpop.eup %2746 }
 0x446   :  { %v3300_v57 = vadd.f32 %v1150_v50, %v1149_v55 }
 0x448   :  { %2748 = vtanh.f32 %v3300_v57 }
 0x452   :  { %v2749_v5 = vpop.eup %2748 }
 0x453   :  { %v1153_v9 = vmul.f32 %v2749_v5, %v2747_v3 }
 0x455   :  { %1226 = vmatmul.mubr.f32.vlgmr.msra.gmra.mrb[8].mxu0 %v1153_v9  ;;  %1297 = vmatmul.mubr.f32.vlgmr.msra.gmra.mrb[8].mxu1 %v1153_v9 }
 0x456   :  { %2399 = vmatpush1.bf16.msra.mxu0 %v2978_v15  ;;  %2431 = vmatpush1.bf16.msra.mxu1 %v2987_v19 }
 0x457   :  { %2401 = vmatprep.subr.bf16.mxu0 %v2990_v23  ;;  %2433 = vmatprep.subr.bf16.mxu1 %v2992_v24 }
 0x458   :  { %1402 = vmatprep.mubr.f32.mxu0 %v2892_v0  ;;  %1473 = vmatprep.mubr.f32.mxu1 %v2892_v0 }
 0x45a   :  { %2403 = vmatpush1.bf16.msra.mxu0 %v2996_v28  ;;  %2435 = vmatpush1.bf16.msra.mxu1 %v3003_v32 }
 0x45b   :  { %2405 = vmatprep.subr.bf16.mxu0 %v3007_v36  ;;  %2437 = vmatprep.subr.bf16.mxu1 %v3009_v37 }
 0x45e   :  { %2407 = vmatpush1.bf16.msra.mxu0 %v3013_v41  ;;  %2439 = vmatpush1.bf16.msra.mxu1 %v3020_v45 }
 0x45f   :  { %2409 = vmatprep.subr.bf16.mxu0 %v3024_v49  ;;  %2441 = vmatprep.subr.bf16.mxu1 %v3028_v53 }
 0x462   :  { %2411 = vmatpush1.bf16.msra.mxu0 %v3032_v56  ;;  %2443 = vmatpush1.bf16.msra.mxu1 %v3036_v60 }
 0x463   :  { %2413 = vmatprep.subr.bf16.mxu0 %v3043_v1  ;;  %2445 = vmatprep.subr.bf16.mxu1 %v3047_v4 }
 0x466   :  { %2415 = vmatpush1.bf16.msra.mxu0 %v3051_v7  ;;  %2447 = vmatpush1.bf16.msra.mxu1 %v3055_v12 }
 0x467   :  { %2417 = vmatprep.subr.bf16.mxu0 %v3062_v17  ;;  %2449 = vmatprep.subr.bf16.mxu1 %v3066_v21 }
 0x46a   :  { %2419 = vmatpush1.bf16.msra.mxu0 %v3070_v26  ;;  %2451 = vmatpush1.bf16.msra.mxu1 %v3074_v30 }
 0x46b   :  { %2421 = vmatprep.subr.bf16.mxu0 %v3081_v35  ;;  %2453 = vmatprep.subr.bf16.mxu1 %v3085_v40 }
 0x46e   :  { %2423 = vmatpush1.bf16.msra.mxu0 %v3089_v44  ;;  %2455 = vmatpush1.bf16.msra.mxu1 %v3093_v48 }
 0x46f   :  { %2425 = vmatprep.subr.bf16.mxu0 %v3100_v54  ;;  %2457 = vmatprep.subr.bf16.mxu1 %v3104_v58 }
 0x472   :  { %2427 = vmatpush1.bf16.msra.mxu0 %v3108_v59  ;;  %2459 = vmatpush1.bf16.msra.mxu1 %v3112_v61 }
 0x473   :  { %2461 = vmatprep.subr.bf16.mxu0 %v2974_v10  ;;  %2493 = vmatprep.subr.bf16.mxu1 %v2976_v11 }
 0x528   :  { %v1227_v62 = vpop.f32.mrb[8].mxu0  ;;  %v1298_v63 = vpop.f32.mrb[8].mxu1 }
 0x529   :  { %v2620_v2 = vadd.f32 %v1227_v62, %v3162_v6  ;;  %v1229_v13 = vpop.f32.mrb[9].mxu0  ;;  %v1300_v14 = vpop.f32.mrb[9].mxu1  ;;  %v2636_v22 = vadd.f32 %v1298_v63, %v3168_v27 }
 0x52a   :  { %v2621_v16 = vadd.f32 %v1229_v13, %v3164_v8  ;;  %v2637_v25 = vadd.f32 %v1300_v14, %v3171_v34 }
 0x52b   :  { %v2011_v18 = vmul.f32 -1.442695, %v2620_v2  ;;  %v2013_v29 = vmul.f32 -1.442695, %v2636_v22 }
 0x52c   :  { %v2012_v20 = vmul.f32 -1.442695, %v2621_v16 }
 0x52d   :  { %2750 = vpow2.f32 %v2011_v18 }
 0x52e   :  { %2752 = vpow2.f32 %v2012_v20 }
 0x52f   :  { %2754 = vtanh.f32 %v2637_v25 }
 0x530   :  { %2756 = vpow2.f32 %v2013_v29 }
 0x537   :  { %v2751_v31 = vpop.eup %2750 }
 0x538   :  { %v1316_v33 = vadd.f32 1.0, %v2751_v31  ;;  %v2753_v38 = vpop.eup %2752 }
 0x539   :  { %v1317_v39 = vadd.f32 1.0, %v2753_v38  ;;  %v2755_v42 = vpop.eup %2754 }
 0x53a   :  { %2758 = vrcp.f32 %v1316_v33  ;;  %v2757_v43 = vpop.eup %2756 }
 0x53b   :  { %2760 = vrcp.f32 %v1317_v39  ;;  %v1318_v51 = vadd.f32 1.0, %v2757_v43 }
 0x53d   :  { %2762 = vrcp.f32 %v1318_v51 }
 0x544   :  { %v2759_v46 = vpop.eup %2758 }
 0x545   :  { %v1327_v47 = vmul.f32 %v2759_v46, %v2755_v42  ;;  %v2761_v50 = vpop.eup %2760 }
 0x546   :  { %v1326_v52 = vmul.f32 %v2761_v50, %v3300_v57 }
 0x547   :  { %v2763_v3 = vpop.eup %2762 }
 0x548   :  { %v3342_v55 = vadd.f32 %v1327_v47, %v1326_v52 }
 0x54a   :  { %2764 = vtanh.f32 %v3342_v55 }
 0x554   :  { %v2765_v5 = vpop.eup %2764 }
 0x555   :  { %v1330_v9 = vmul.f32 %v2765_v5, %v2763_v3  ;;  %v1865_v5 = vld [vmem:[#allocation6 + $0x18] sm:$0xff] }
 0x557   :  { %1403 = vmatmul.mubr.f32.vlgmr.msra.gmra.mrb[10].mxu0 %v1330_v9  ;;  %1474 = vmatmul.mubr.f32.vlgmr.msra.gmra.mrb[10].mxu1 %v1330_v9 }
 0x558   :  { %2463 = vmatpush1.bf16.msra.mxu0 %v2978_v15  ;;  %2495 = vmatpush1.bf16.msra.mxu1 %v2987_v19 }
 0x559   :  { %2465 = vmatprep.subr.bf16.mxu0 %v2990_v23  ;;  %2497 = vmatprep.subr.bf16.mxu1 %v2992_v24 }
 0x55a   :  { %1579 = vmatprep.mubr.f32.mxu0 %v2892_v0  ;;  %1650 = vmatprep.mubr.f32.mxu1 %v2892_v0 }
 0x55c   :  { %2467 = vmatpush1.bf16.msra.mxu0 %v2996_v28  ;;  %2499 = vmatpush1.bf16.msra.mxu1 %v3003_v32 }
 0x55d   :  { %2469 = vmatprep.subr.bf16.mxu0 %v3007_v36  ;;  %2501 = vmatprep.subr.bf16.mxu1 %v3009_v37 }
 0x560   :  { %2471 = vmatpush1.bf16.msra.mxu0 %v3013_v41  ;;  %2503 = vmatpush1.bf16.msra.mxu1 %v3020_v45 }
 0x561   :  { %2473 = vmatprep.subr.bf16.mxu0 %v3024_v49  ;;  %2505 = vmatprep.subr.bf16.mxu1 %v3028_v53 }
 0x564   :  { %2475 = vmatpush1.bf16.msra.mxu0 %v3032_v56  ;;  %2507 = vmatpush1.bf16.msra.mxu1 %v3036_v60 }
 0x565   :  { %2477 = vmatprep.subr.bf16.mxu0 %v3043_v1  ;;  %2509 = vmatprep.subr.bf16.mxu1 %v3047_v4 }
 0x568   :  { %2479 = vmatpush1.bf16.msra.mxu0 %v3051_v7  ;;  %2511 = vmatpush1.bf16.msra.mxu1 %v3055_v12 }
 0x569   :  { %2481 = vmatprep.subr.bf16.mxu0 %v3062_v17  ;;  %2513 = vmatprep.subr.bf16.mxu1 %v3066_v21 }
 0x56c   :  { %2483 = vmatpush1.bf16.msra.mxu0 %v3070_v26  ;;  %2515 = vmatpush1.bf16.msra.mxu1 %v3074_v30 }
 0x56d   :  { %2485 = vmatprep.subr.bf16.mxu0 %v3081_v35  ;;  %2517 = vmatprep.subr.bf16.mxu1 %v3085_v40 }
 0x570   :  { %2487 = vmatpush1.bf16.msra.mxu0 %v3089_v44  ;;  %2519 = vmatpush1.bf16.msra.mxu1 %v3093_v48 }
 0x571   :  { %2489 = vmatprep.subr.bf16.mxu0 %v3100_v54  ;;  %2521 = vmatprep.subr.bf16.mxu1 %v3104_v58 }
 0x574   :  { %2491 = vmatpush1.bf16.msra.mxu0 %v3108_v59  ;;  %2523 = vmatpush1.bf16.msra.mxu1 %v3112_v61 }
 0x575   :  { %2525 = vmatprep.subr.bf16.mxu0 %v2974_v10  ;;  %2557 = vmatprep.subr.bf16.mxu1 %v2976_v11 }
 0x62a   :  { %v1404_v57 = vpop.f32.mrb[10].mxu0  ;;  %v1475_v62 = vpop.f32.mrb[10].mxu1 }
 0x62b   :  { %v2622_v63 = vadd.f32 %v1404_v57, %v3162_v6  ;;  %v1406_v2 = vpop.f32.mrb[11].mxu0  ;;  %v1477_v13 = vpop.f32.mrb[11].mxu1  ;;  %v2638_v20 = vadd.f32 %v1475_v62, %v3168_v27  ;;  %v1866_v57 = vld [vmem:[#allocation6 + $0x20] sm:$0xff]  ;;  %v1867_v62 = vld [vmem:[#allocation6 + $0x28] sm:$0xff] }
 0x62c   :  { %v2623_v14 = vadd.f32 %v1406_v2, %v3164_v8  ;;  %v2639_v22 = vadd.f32 %v1477_v13, %v3171_v34  ;;  %v1868_v2 = vld [vmem:[#allocation6 + $0x30] sm:$0xff]  ;;  %v1869_v13 = vld [vmem:[#allocation6 + $0x38] sm:$0xff] }
 0x62d   :  { %v2014_v16 = vmul.f32 -1.442695, %v2622_v63  ;;  %v2016_v25 = vmul.f32 -1.442695, %v2638_v20  ;;  %v2595_v63 = vpack.c.bf16 %v1867_v62, %v1866_v57 }
 0x62e   :  { %v2015_v18 = vmul.f32 -1.442695, %v2623_v14  ;;  %v2598_v14 = vpack.c.bf16 %v1869_v13, %v1868_v2 }
 0x62f   :  { %2766 = vpow2.f32 %v2014_v16  ;;  %v1870_v16 = vld [vmem:[#allocation6 + $0x40] sm:$0xff] }
 0x630   :  { %2768 = vpow2.f32 %v2015_v18  ;;  %v1871_v18 = vld [vmem:[#allocation6 + $0x48] sm:$0xff] }
 0x631   :  { %2770 = vtanh.f32 %v2639_v22  ;;  %v2601_v20 = vpack.c.bf16 %v1871_v18, %v1870_v16  ;;  %v1872_v22 = vld [vmem:[#allocation6 + $0x50] sm:$0xff] }
 0x632   :  { %2772 = vpow2.f32 %v2016_v25  ;;  %v1873_v25 = vld [vmem:[#allocation6 + $0x58] sm:$0xff] }
 0x639   :  { %v2767_v10 = vpop.eup %2766 }
 0x63a   :  { %v1493_v29 = vadd.f32 1.0, %v2767_v10  ;;  %v2769_v11 = vpop.eup %2768  ;;  %v2604_v10 = vpack.c.bf16 %v1873_v25, %v1872_v22 }
 0x63b   :  { %v1494_v31 = vadd.f32 1.0, %v2769_v11  ;;  %v2771_v33 = vpop.eup %2770  ;;  %v1875_v11 = vld [vmem:[#allocation6 + $0x68] sm:$0xff] }
 0x63c   :  { %2774 = vrcp.f32 %v1493_v29  ;;  %v2773_v38 = vpop.eup %2772  ;;  %v1874_v29 = vld [vmem:[#allocation6 + $0x60] sm:$0xff] }
 0x63d   :  { %2776 = vrcp.f32 %v1494_v31  ;;  %v1495_v46 = vadd.f32 1.0, %v2773_v38  ;;  %v2607_v31 = vpack.c.bf16 %v1875_v11, %v1874_v29  ;;  %v1877_v38 = vld [vmem:[#allocation6 + $0x78] sm:$0xff] }
 0x63f   :  { %2778 = vrcp.f32 %v1495_v46 }
 0x646   :  { %v2775_v39 = vpop.eup %2774 }
 0x647   :  { %v1504_v42 = vmul.f32 %v2775_v39, %v2771_v33  ;;  %v2777_v43 = vpop.eup %2776  ;;  %v1876_v33 = vld [vmem:[#allocation6 + $0x70] sm:$0xff] }
 0x648   :  { %v1503_v47 = vmul.f32 %v2777_v43, %v3342_v55  ;;  %v1864_v55 = vld [vmem:[#allocation6 + $0x10] sm:$0xff]  ;;  %v2610_v39 = vpack.c.bf16 %v1877_v38, %v1876_v33 }
 0x649   :  { %v2779_v51 = vpop.eup %2778  ;;  %v2592_v9 = vpack.c.bf16 %v1865_v5, %v1864_v55 }
 0x64a   :  { %v3384_v50 = vadd.f32 %v1504_v42, %v1503_v47 }
 0x64c   :  { %2780 = vtanh.f32 %v3384_v50 }
 0x656   :  { %v2781_v52 = vpop.eup %2780 }
 0x657   :  { %v1507_v3 = vmul.f32 %v2781_v52, %v2779_v51 }
 0x659   :  { %1580 = vmatmul.mubr.f32.vlgmr.msra.gmra.mrb[12].mxu0 %v1507_v3  ;;  %1651 = vmatmul.mubr.f32.vlgmr.msra.gmra.mrb[12].mxu1 %v1507_v3 }
 0x65a   :  { %2527 = vmatpush1.bf16.msra.mxu0 %v2978_v15  ;;  %2559 = vmatpush1.bf16.msra.mxu1 %v2987_v19 }
 0x65b   :  { %2529 = vmatprep.subr.bf16.mxu0 %v2990_v23  ;;  %2561 = vmatprep.subr.bf16.mxu1 %v2992_v24 }
 0x65c   :  { %1756 = vmatprep.mubr.f32.mxu0 %v2892_v0  ;;  %1827 = vmatprep.mubr.f32.mxu1 %v2892_v0 }
 0x65e   :  { %2531 = vmatpush1.bf16.msra.mxu0 %v2996_v28  ;;  %2563 = vmatpush1.bf16.msra.mxu1 %v3003_v32 }
 0x65f   :  { %2533 = vmatprep.subr.bf16.mxu0 %v3007_v36  ;;  %2565 = vmatprep.subr.bf16.mxu1 %v3009_v37 }
 0x662   :  { %2535 = vmatpush1.bf16.msra.mxu0 %v3013_v41  ;;  %2567 = vmatpush1.bf16.msra.mxu1 %v3020_v45 }
 0x663   :  { %2537 = vmatprep.subr.bf16.mxu0 %v3024_v49  ;;  %2569 = vmatprep.subr.bf16.mxu1 %v3028_v53 }
 0x666   :  { %2539 = vmatpush1.bf16.msra.mxu0 %v3032_v56  ;;  %2571 = vmatpush1.bf16.msra.mxu1 %v3036_v60 }
 0x667   :  { %2541 = vmatprep.subr.bf16.mxu0 %v3043_v1  ;;  %2573 = vmatprep.subr.bf16.mxu1 %v3047_v4 }
 0x66a   :  { %2543 = vmatpush1.bf16.msra.mxu0 %v3051_v7  ;;  %2575 = vmatpush1.bf16.msra.mxu1 %v3055_v12 }
 0x66b   :  { %2545 = vmatprep.subr.bf16.mxu0 %v3062_v17  ;;  %2577 = vmatprep.subr.bf16.mxu1 %v3066_v21 }
 0x66e   :  { %2547 = vmatpush1.bf16.msra.mxu0 %v3070_v26  ;;  %2579 = vmatpush1.bf16.msra.mxu1 %v3074_v30 }
 0x66f   :  { %2549 = vmatprep.subr.bf16.mxu0 %v3081_v35  ;;  %2581 = vmatprep.subr.bf16.mxu1 %v3085_v40 }
 0x672   :  { %2551 = vmatpush1.bf16.msra.mxu0 %v3089_v44  ;;  %2583 = vmatpush1.bf16.msra.mxu1 %v3093_v48 }
 0x673   :  { %2553 = vmatprep.subr.bf16.mxu0 %v3100_v54  ;;  %2585 = vmatprep.subr.bf16.mxu1 %v3104_v58  ;;  %v1862_v54 = vld [vmem:[#allocation6] sm:$0xff]  ;;  %v1863_v58 = vld [vmem:[#allocation6 + $0x8] sm:$0xff] }
 0x676   :  { %2555 = vmatpush1.bf16.msra.mxu0 %v3108_v59  ;;  %2587 = vmatpush1.bf16.msra.mxu1 %v3112_v61  ;;  %v2589_v59 = vpack.c.bf16 %v1863_v58, %v1862_v54  ;;  %v2893_v61 = vmov 0.0|0.0  }
 0x677   :  { %2588 = vmatprep.subr.bf16.mxu0 %v2893_v61 }
 0x72c   :  { %v1581_v15 = vpop.f32.mrb[12].mxu0  ;;  %v1652_v19 = vpop.f32.mrb[12].mxu1 }
 0x72d   :  { %v2624_v23 = vadd.f32 %v1581_v15, %v3162_v6  ;;  %v1583_v24 = vpop.f32.mrb[13].mxu0  ;;  %v1654_v28 = vpop.f32.mrb[13].mxu1  ;;  %v2640_v41 = vadd.f32 %v1652_v19, %v3168_v27 }
 0x72e   :  { %v2625_v32 = vadd.f32 %v1583_v24, %v3164_v8  ;;  %v2641_v45 = vadd.f32 %v1654_v28, %v3171_v34 }
 0x72f   :  { %v2017_v36 = vmul.f32 -1.442695, %v2624_v23  ;;  %v2019_v49 = vmul.f32 -1.442695, %v2640_v41 }
 0x730   :  { %v2018_v37 = vmul.f32 -1.442695, %v2625_v32 }
 0x731   :  { %2782 = vpow2.f32 %v2017_v36 }
 0x732   :  { %2784 = vpow2.f32 %v2018_v37 }
 0x733   :  { %2786 = vtanh.f32 %v2641_v45 }
 0x734   :  { %2788 = vpow2.f32 %v2019_v49 }
 0x73b   :  { %v2783_v53 = vpop.eup %2782 }
 0x73c   :  { %v1670_v56 = vadd.f32 1.0, %v2783_v53  ;;  %v2785_v60 = vpop.eup %2784 }
 0x73d   :  { %v1671_v1 = vadd.f32 1.0, %v2785_v60  ;;  %v2787_v4 = vpop.eup %2786  ;;  %v2023_v60 = vld [vmem:[%s3453_s5] ss:$0 sm:$0xff] }
 0x73e   :  { %2790 = vrcp.f32 %v1670_v56  ;;  %v2789_v7 = vpop.eup %2788 }
 0x73f   :  { %2792 = vrcp.f32 %v1671_v1  ;;  %v1672_v26 = vadd.f32 1.0, %v2789_v7 }
 0x741   :  { %2794 = vrcp.f32 %v1672_v26 }
 0x748   :  { %v2791_v12 = vpop.eup %2790 }
 0x749   :  { %v1681_v17 = vmul.f32 %v2791_v12, %v2787_v4  ;;  %v2793_v21 = vpop.eup %2792 }
 0x74a   :  { %v1680_v30 = vmul.f32 %v2793_v21, %v3384_v50 }
 0x74b   :  { %v2795_v40 = vpop.eup %2794 }
 0x74c   :  { %v3424_v35 = vadd.f32 %v1681_v17, %v1680_v30 }
 0x74e   :  { %2796 = vtanh.f32 %v3424_v35 }
 0x758   :  { %v2797_v44 = vpop.eup %2796 }
 0x759   :  { %v1684_v48 = vmul.f32 %v2797_v44, %v2795_v40 }
 0x75b   :  { %1757 = vmatmul.mubr.f32.vlgmr.msra.gmra.mrb[14].mxu0 %v1684_v48  ;;  %1828 = vmatmul.mubr.f32.vlgmr.msra.gmra.mrb[14].mxu1 %v1684_v48 }
 0x75c   :  { %2590 = vmatpush3.bf16.msra.mxu0 %v2589_v59  ;;  %2073 = vmatprep.mubr.msk.f32.mxu0 %vm2894_vm2, %v2892_v0 }
 0x75d   :  { %2591 = vmatprep.subr.bf16.mxu0 %v2893_v61 }
 0x760   :  { %2593 = vmatpush3.bf16.msra.mxu0 %v2592_v9 }
 0x761   :  { %2594 = vmatprep.subr.bf16.mxu0 %v2893_v61 }
 0x764   :  { %2596 = vmatpush3.bf16.msra.mxu0 %v2595_v63 }
 0x765   :  { %2597 = vmatprep.subr.bf16.mxu0 %v2893_v61 }
 0x768   :  { %2599 = vmatpush3.bf16.msra.mxu0 %v2598_v14 }
 0x769   :  { %2600 = vmatprep.subr.bf16.mxu0 %v2893_v61 }
 0x76c   :  { %2602 = vmatpush3.bf16.msra.mxu0 %v2601_v20 }
 0x76d   :  { %2603 = vmatprep.subr.bf16.mxu0 %v2893_v61 }
 0x770   :  { %2605 = vmatpush3.bf16.msra.mxu0 %v2604_v10 }
 0x771   :  { %2606 = vmatprep.subr.bf16.mxu0 %v2893_v61 }
 0x774   :  { %2608 = vmatpush3.bf16.msra.mxu0 %v2607_v31 }
 0x775   :  { %2609 = vmatprep.subr.bf16.mxu0 %v2893_v61 }
 0x778   :  { %2611 = vmatpush3.bf16.msra.mxu0 %v2610_v39 }
 0x82e   :  { %v1758_v42 = vpop.f32.mrb[14].mxu0  ;;  %v1829_v43 = vpop.f32.mrb[14].mxu1 }
 0x82f   :  { %v2626_v46 = vadd.f32 %v1758_v42, %v3162_v6  ;;  %v1760_v47 = vpop.f32.mrb[15].mxu0  ;;  %v1831_v50 = vpop.f32.mrb[15].mxu1  ;;  %v2642_v0 = vadd.f32 %v1829_v43, %v3168_v27 }
 0x830   :  { %v2627_v51 = vadd.f32 %v1760_v47, %v3164_v8  ;;  %v2643_v15 = vadd.f32 %v1831_v50, %v3171_v34 }
 0x831   :  { %v2020_v52 = vmul.f32 -1.442695, %v2626_v46  ;;  %v2022_v19 = vmul.f32 -1.442695, %v2642_v0 }
 0x832   :  { %v2021_v3 = vmul.f32 -1.442695, %v2627_v51 }
 0x833   :  { %2798 = vpow2.f32 %v2020_v52 }
 0x834   :  { %2800 = vpow2.f32 %v2021_v3 }
 0x835   :  { %2802 = vtanh.f32 %v2643_v15 }
 0x836   :  { %2804 = vpow2.f32 %v2022_v19 }
 0x83d   :  { %v2799_v23 = vpop.eup %2798 }
 0x83e   :  { %v1847_v24 = vadd.f32 1.0, %v2799_v23  ;;  %v2801_v28 = vpop.eup %2800 }
 0x83f   :  { %v1848_v6 = vadd.f32 1.0, %v2801_v28  ;;  %v2803_v32 = vpop.eup %2802 }
 0x840   :  { %2806 = vrcp.f32 %v1847_v24  ;;  %v2805_v36 = vpop.eup %2804 }
 0x841   :  { %2808 = vrcp.f32 %v1848_v6  ;;  %v1849_v45 = vadd.f32 1.0, %v2805_v36 }
 0x843   :  { %2810 = vrcp.f32 %v1849_v45 }
 0x84a   :  { %v2807_v8 = vpop.eup %2806 }
 0x84b   :  { %v1858_v37 = vmul.f32 %v2807_v8, %v2803_v32  ;;  %v2809_v41 = vpop.eup %2808 }
 0x84c   :  { %v1857_v49 = vmul.f32 %v2809_v41, %v3424_v35 }
 0x84d   :  { %v2811_v34 = vpop.eup %2810 }
 0x84e   :  { %v1859_v27 = vadd.f32 %v1858_v37, %v1857_v49 }
 0x850   :  { %2812 = vtanh.f32 %v1859_v27 }
 0x85a   :  { %v2813_v53 = vpop.eup %2812 }
 0x85b   :  { %v1861_v56 = vmul.f32 %v2813_v53, %v2811_v34 }
 0x85d   :  { %2074 = vmatmul.mubr.f32.vlgmr.msra.gmra.mrb[16].mxu0 %v1861_v56 }
 0x930   :  { %v1951_v1 = vpop.f32.mrb[16].mxu0 }
 0x931   :  { %v1952_v4 = vadd.f32 %v2023_v60, %v1951_v1  ;;  %v2075_v7 = vpop.f32.mrb[17].mxu0 }
 0x933   :  { %1955 = vst [vmem:[#allocation8] sm:$0xff] %v1952_v4 }
 0x934   :  { %2869 = shalt.err (!%p2866_p6)
}
 0x935   :  { %s2870_s4 = scalar_lea.hbm %s3454_s6, 128 }
 0x936   :  { %p2871_p7 = scmp.ne.s32.totalorder %s3454_s6, %s2870_s4  ;;  %p2874_p8 = scmp.lt.u32.totalorder %s2870_s4, %s3454_s6 }
 0x938   :  { %p2876_p9 = pnand %p2874_p8, %p2871_p7 }
 0x93a   :  { %2879 = shalt.err (!%p2876_p9)
}
 0x93b   :  { %1965 = dma.vmem_to_hbm [thread:$0]  %s1963_s24, 128, %s3454_s6, [#allocation5]  }
 0x93c   :  { %2884 = dma.done.wait [#allocation5], 128  }
 0x93d   :  { %2885 = vsyncadd [#allocation5], 4294967168 }
 0x93e   :  { %1969 = vsyncpa [#allocation4], 1 }
 0x93f   :  { %1970 = vsyncpa [#allocation7], 1 }
 0x940   :  { %1971 = vsyncpa [#allocation5], 1 }

</bundles_post_ra>
